<compile_context>
chip_gen: v7x
topology: tpu7x:2x2x1
jax: 0.10.0
libtpu: 0.0.40
codegen_flags: <defaults>
</compile_context>

<pallas_src>
import jax
import jax.numpy as jnp
from jax.experimental import pallas as pl
from jax.experimental.pallas import tpu as pltpu


def _gmsr_kernel(x_ref, hs_ref, w_ref, b_ref, csr_ref,
                 fcw_ref, fcb_ref, fcw2_ref, fcb2_ref, out_ref, emb_ref):
    seq, batch, kh = out_ref.shape     # kh = k * h  (flat, lane-dense width)
    h = fcw_ref.shape[1]
    k = kh // h
    hp = jax.lax.Precision.HIGHEST

    # ---- Phase 1: input-embedding MLP for every timestep at once (hoisted
    # out of the recurrence).  FC_W2 / FC_B2 arrive pre-tiled over k, so emb
    # is a lane-dense (seq*batch, kh) slab whose k h-blocks are identical.
    # It is parked in a VMEM scratch and re-loaded per step (review item 3).
    x = x_ref[...]                                               # (seq*batch, in)
    e1 = jnp.maximum(
        jnp.dot(x, fcw_ref[...], preferred_element_type=jnp.float32,
                precision=hp) + fcb_ref[...], 0.0)
    emb_ref[...] = (jnp.dot(e1, fcw2_ref[...],
                            preferred_element_type=jnp.float32,
                            precision=hp) + fcb2_ref[...]) * 0.125

    # ---- Phase 2: recurrence on the flat (batch, kh) state.
    csr = csr_ref[...]                                           # (1, kh)
    W = w_ref[...]                                               # (kh, kh)
    B = b_ref[...]                                               # (1, kh)
    lane = jax.lax.broadcasted_iota(jnp.int32, (batch, kh), 1)   # hoisted
    newest = lane >= (k - 1) * h          # lanes of the newest state slot

    def group_reduce(v, op):
        # Reduce over the k lanes {t, t+h, ..., t+(k-1)h} of each hidden index
        # t; the result is broadcast back over every lane of its group.
        # Cyclic lane rolls (XLU) in a log2(k) tree for power-of-two k
        # (review item 2); linear chain fallback otherwise.
        if k & (k - 1) == 0:
            r = v
            step = h
            while step < kh:
                r = op(r, pltpu.roll(r, shift=step, axis=1))
                step *= 2
            return r
        r = v
        for j in range(1, k):
            r = op(r, pltpu.roll(v, shift=j * h, axis=1))
        return r

    preH = jnp.tanh(hs_ref[...])                                 # (batch, kh)

    # seq=8: keep the static Python loop fully unrolled (per review); switch
    # to lax.fori_loop(..., unroll=4/8) if seq is scaled up.
    for i in range(seq):
        preH = preH * csr                                        # rotation
        att = jnp.dot(preH, W, preferred_element_type=jnp.float32,
                      precision=hp) + B                          # (batch, kh)
        # softmax over the k axis of |att / 2| in the flat lane layout.
        # No max-subtraction: softmax is shift-invariant and |att/2| stays far
        # below the f32 exp-overflow threshold (~88) at these scales, so this
        # drops one group reduction from the serial chain (review, optional).
        s = jnp.abs(att) * 0.5
        e = jnp.exp(s)
        denom = group_reduce(e, jnp.add)            # sum_j exp(s_j), bcast
        num = group_reduce(preH * e, jnp.add)       # sum_j preH_j exp(s_j)
        # Single divide per step ( == sum_j preH_j * softmax_j, bcast over k).
        # pl.reciprocal(denom, approx=True) is the EUP option if ever needed.
        gsum = num / denom
        # emb row slice from VMEM scratch; start is a static multiple of batch.
        emb_i = emb_ref[pl.ds(i * batch, batch), :]
        # new hidden output on all kh lanes (each h-block identical) -> the
        # per-step store below is a full-128-lane unmasked store (review #1).
        h_full = jnp.tanh(emb_i + gsum)
        out_ref[i] = h_full
        # carry update: shift out the oldest h-block, append the new output
        # (lane roll + masked select; jnp.roll semantics: lane l <- lane l+h).
        preH = jnp.where(newest, h_full,
                         pltpu.roll(preH, shift=kh - h, axis=1))


def gmsr_forward(inputs, hidden_states, params):
    """inputs: (seq, batch, input_size); hidden_states: (k, batch, h)."""
    W, B, R, FC_W, FC_B, FC_W2, FC_B2 = params
    seq, batch, in_size = inputs.shape
    k, _, h = hidden_states.shape
    kh = k * h
    if seq < k:
        raise ValueError(f"seq_len ({seq}) must be >= k ({k}) to build H "
                         f"(matches the PyTorch module's assumption).")

    # ---- Parameter / input re-layout (plain-JAX glue only) ----
    R3 = R.reshape(k, h // 2)
    csr = jnp.concatenate([jnp.cos(R3), jnp.sin(R3)], axis=-1).reshape(1, kh)
    hs_flat = jnp.moveaxis(hidden_states, 0, 1).reshape(batch, kh)  # concat over k
    x2 = inputs.reshape(seq * batch, in_size)
    # Tile second-FC params over k so the in-kernel embedding add is lane-dense.
    FC_W2_t = jnp.tile(FC_W2, (1, k))
    FC_B2_t = jnp.tile(FC_B2, (1, k))

    # Single invocation: every operand is resident in VMEM as one full block
    # (~80 KiB total here, incl. the emb scratch).
    out_full = pl.pallas_call(
        _gmsr_kernel,
        out_shape=jax.ShapeDtypeStruct((seq, batch, kh), jnp.float32),
        scratch_shapes=[pltpu.VMEM((seq * batch, kh), jnp.float32)],
    )(x2, hs_flat, W, B, csr, FC_W, FC_B, FC_W2_t, FC_B2_t)

    # Lane-dense kernel output -> slice the first h lanes here (review item 1).
    h_return = out_full[:, :, :h]            # (seq, batch, h)
    H = h_return[seq - k:]                   # last k step outputs, (k, batch, h)
    return h_return, H


def gmsr_reference(inputs, hidden_states, params):
    """Pure-JAX transcription of the PyTorch forward (for verification)."""
    W, B, R, FC_W, FC_B, FC_W2, FC_B2 = params
    seq, batch, _ = inputs.shape
    k, _, h = hidden_states.shape
    hp = jax.lax.Precision.HIGHEST

    emb = jnp.maximum(jnp.dot(inputs, FC_W, precision=hp) + FC_B, 0.0)
    emb = jnp.dot(emb, FC_W2, precision=hp) + FC_B2

    preH = jnp.tanh(jnp.concatenate([hidden_states[j] for j in range(k)], axis=-1))
    R3 = R.reshape(1, k, -1)
    csr = jnp.concatenate([jnp.cos(R3), jnp.sin(R3)], axis=-1).reshape(1, -1)

    outs = []
    for i in range(seq):
        preH = preH * csr
        att = jnp.dot(preH, W, precision=hp) + B
        preH3 = preH.reshape(batch, k, -1)
        att3 = att.reshape(batch, k, -1)
        attn = jax.nn.softmax(jnp.abs(att3 / 2.0), axis=1)
        preH_input = (preH3 * attn).sum(1)
        h_out = jnp.tanh(emb[i] / 8 + preH_input)
        outs.append(h_out)
        preH = jnp.concatenate([preH3[:, 1:, :].reshape(batch, -1), h_out], axis=-1)

    h_return = jnp.stack(outs)
    H = jnp.concatenate(outs[-k:], axis=-1).reshape(batch, k, -1).swapaxes(0, 1)
    return h_return, H


if __name__ == "__main__":
    # Small shapes consistent with the module: k=4, h=32, input_size=h (the
    # PyTorch code requires input_size == h for the second matmul to typecheck).
    k, h, input_size = 4, 32, 32
    seq_len, batch = 8, 2

    key = jax.random.PRNGKey(0)
    ks = jax.random.split(key, 9)
    params = (
        jax.random.normal(ks[0], (k * h, k * h), jnp.float32),      # W
        jax.random.normal(ks[1], (1, k * h), jnp.float32),          # B
        jax.random.normal(ks[2], (1, k * h // 2), jnp.float32),     # R
        jax.random.normal(ks[3], (input_size, h), jnp.float32),     # FC_W
        jax.random.normal(ks[4], (1, h), jnp.float32),              # FC_B
        jax.random.normal(ks[5], (input_size, h), jnp.float32),     # FC_W2
        jax.random.normal(ks[6], (1, h), jnp.float32),              # FC_B2
    )
    inputs = jax.random.normal(ks[7], (seq_len, batch, input_size), jnp.float32)
    hidden_states = jax.random.normal(ks[8], (k, batch, h), jnp.float32)

    h_return, H = gmsr_forward(inputs, hidden_states, params)
    jax.block_until_ready((h_return, H))

    h_ref, H_ref = gmsr_reference(inputs, hidden_states, params)
    assert h_return.shape == (seq_len, batch, h)
    assert H.shape == (k, batch, h)
    assert jnp.allclose(h_return, h_ref, rtol=1e-3, atol=1e-3)
    assert jnp.allclose(H, H_ref, rtol=1e-3, atol=1e-3)

    print("KERNEL_OK")
</pallas_src>

<mosaic_0001>
module attributes {stable_mosaic.version = 11 : i64} {
  func.func @_gmsr_kernel(%arg0: memref<16x32xf32, #tpu.memory_space<vmem>>, %arg1: memref<2x128xf32, #tpu.memory_space<vmem>>, %arg2: memref<128x128xf32, #tpu.memory_space<vmem>>, %arg3: memref<1x128xf32, #tpu.memory_space<vmem>>, %arg4: memref<1x128xf32, #tpu.memory_space<vmem>>, %arg5: memref<32x32xf32, #tpu.memory_space<vmem>>, %arg6: memref<1x32xf32, #tpu.memory_space<vmem>>, %arg7: memref<32x128xf32, #tpu.memory_space<vmem>>, %arg8: memref<1x128xf32, #tpu.memory_space<vmem>>, %arg9: memref<8x2x128xf32, #tpu.memory_space<vmem>>, %arg10: memref<16x128xf32, #tpu.memory_space<vmem>>) attributes {dimension_semantics = [], scalar_prefetch = 0 : i64, scratch_operands = 1 : i64, tpu.core_type = #tpu.core_type<tc>} {
    %c0 = arith.constant 0 : index
    %c0_0 = arith.constant 0 : index
    %0 = vector.load %arg0[%c0, %c0_0] : memref<16x32xf32, #tpu.memory_space<vmem>>, vector<16x32xf32>
    %c0_1 = arith.constant 0 : index
    %c0_2 = arith.constant 0 : index
    %1 = vector.load %arg5[%c0_1, %c0_2] : memref<32x32xf32, #tpu.memory_space<vmem>>, vector<32x32xf32>
    %cst = arith.constant dense<0.000000e+00> : vector<16x32xf32>
    %2 = tpu.matmul %0, %1, %cst {dimension_numbers = #tpu.dot_dimension_numbers<[1], [0], [0], [1], [0, 0, 1, 1], [], []>, precision = #tpu.contract_precision<fp32>} : vector<16x32xf32>, vector<32x32xf32>, vector<16x32xf32> -> vector<16x32xf32>
    %c0_3 = arith.constant 0 : index
    %c0_4 = arith.constant 0 : index
    %3 = vector.load %arg6[%c0_3, %c0_4] : memref<1x32xf32, #tpu.memory_space<vmem>>, vector<1x32xf32>
    %4 = vector.broadcast %3 : vector<1x32xf32> to vector<16x32xf32>
    %5 = arith.addf %2, %4 : vector<16x32xf32>
    %cst_5 = arith.constant 0.000000e+00 : f32
    %6 = vector.broadcast %cst_5 : f32 to vector<16x32xf32>
    %7 = arith.maximumf %5, %6 : vector<16x32xf32>
    %c0_6 = arith.constant 0 : index
    %c0_7 = arith.constant 0 : index
    %8 = vector.load %arg7[%c0_6, %c0_7] : memref<32x128xf32, #tpu.memory_space<vmem>>, vector<32x128xf32>
    %cst_8 = arith.constant dense<0.000000e+00> : vector<16x128xf32>
    %9 = tpu.matmul %7, %8, %cst_8 {dimension_numbers = #tpu.dot_dimension_numbers<[1], [0], [0], [1], [0, 0, 1, 1], [], []>, precision = #tpu.contract_precision<fp32>} : vector<16x32xf32>, vector<32x128xf32>, vector<16x128xf32> -> vector<16x128xf32>
    %c0_9 = arith.constant 0 : index
    %c0_10 = arith.constant 0 : index
    %10 = vector.load %arg8[%c0_9, %c0_10] : memref<1x128xf32, #tpu.memory_space<vmem>>, vector<1x128xf32>
    %11 = vector.broadcast %10 : vector<1x128xf32> to vector<16x128xf32>
    %12 = arith.addf %9, %11 : vector<16x128xf32>
    %cst_11 = arith.constant 1.250000e-01 : f32
    %13 = vector.broadcast %cst_11 : f32 to vector<16x128xf32>
    %14 = arith.mulf %12, %13 : vector<16x128xf32>
    %c0_12 = arith.constant 0 : index
    %c0_13 = arith.constant 0 : index
    %15 = vector.load %arg10[%c0_12, %c0_13] : memref<16x128xf32, #tpu.memory_space<vmem>>, vector<16x128xf32>
    tpu.vector_store %arg10[%c0_12, %c0_13], %14 {strides = array<i32>} : memref<16x128xf32, #tpu.memory_space<vmem>>, vector<16x128xf32>,
    %c0_14 = arith.constant 0 : index
    %c0_15 = arith.constant 0 : index
    %16 = vector.load %arg4[%c0_14, %c0_15] : memref<1x128xf32, #tpu.memory_space<vmem>>, vector<1x128xf32>
    %c0_16 = arith.constant 0 : index
    %c0_17 = arith.constant 0 : index
    %17 = vector.load %arg2[%c0_16, %c0_17] : memref<128x128xf32, #tpu.memory_space<vmem>>, vector<128x128xf32>
    %c0_18 = arith.constant 0 : index
    %c0_19 = arith.constant 0 : index
    %18 = vector.load %arg3[%c0_18, %c0_19] : memref<1x128xf32, #tpu.memory_space<vmem>>, vector<1x128xf32>
    %19 = tpu.iota {dimensions = array<i32: 1>} : vector<2x128xi32>
    %c96_i32 = arith.constant 96 : i32
    %20 = vector.broadcast %c96_i32 : i32 to vector<2x128xi32>
    %21 = arith.cmpi sge, %19, %20 : vector<2x128xi32>
    %c0_20 = arith.constant 0 : index
    %c0_21 = arith.constant 0 : index
    %22 = vector.load %arg1[%c0_20, %c0_21] : memref<2x128xf32, #tpu.memory_space<vmem>>, vector<2x128xf32>
    %23 = math.tanh %22 : vector<2x128xf32>
    %24 = vector.broadcast %16 : vector<1x128xf32> to vector<2x128xf32>
    %25 = arith.mulf %23, %24 : vector<2x128xf32>
    %cst_22 = arith.constant dense<0.000000e+00> : vector<2x128xf32>
    %26 = tpu.matmul %25, %17, %cst_22 {dimension_numbers = #tpu.dot_dimension_numbers<[1], [0], [0], [1], [0, 0, 1, 1], [], []>, precision = #tpu.contract_precision<fp32>} : vector<2x128xf32>, vector<128x128xf32>, vector<2x128xf32> -> vector<2x128xf32>
    %27 = vector.broadcast %18 : vector<1x128xf32> to vector<2x128xf32>
    %28 = arith.addf %26, %27 : vector<2x128xf32>
    %29 = math.absf %28 : vector<2x128xf32>
    %cst_23 = arith.constant 5.000000e-01 : f32
    %30 = vector.broadcast %cst_23 : f32 to vector<2x128xf32>
    %31 = arith.mulf %29, %30 : vector<2x128xf32>
    %32 = math.exp %31 : vector<2x128xf32>
    %c32_i32 = arith.constant 32 : i32
    %33 = tpu.dynamic_rotate %32 by %c32_i32 dim 1 : vector<2x128xf32>, i32 -> vector<2x128xf32>
    %34 = arith.addf %32, %33 : vector<2x128xf32>
    %c64_i32 = arith.constant 64 : i32
    %35 = tpu.dynamic_rotate %34 by %c64_i32 dim 1 : vector<2x128xf32>, i32 -> vector<2x128xf32>
    %36 = arith.addf %34, %35 : vector<2x128xf32>
    %37 = arith.mulf %25, %32 : vector<2x128xf32>
    %c32_i32_24 = arith.constant 32 : i32
    %38 = tpu.dynamic_rotate %37 by %c32_i32_24 dim 1 : vector<2x128xf32>, i32 -> vector<2x128xf32>
    %39 = arith.addf %37, %38 : vector<2x128xf32>
    %c64_i32_25 = arith.constant 64 : i32
    %40 = tpu.dynamic_rotate %39 by %c64_i32_25 dim 1 : vector<2x128xf32>, i32 -> vector<2x128xf32>
    %41 = arith.addf %39, %40 : vector<2x128xf32>
    %42 = arith.divf %41, %36 : vector<2x128xf32>
    %c0_26 = arith.constant 0 : index
    %c0_27 = arith.constant 0 : index
    %43 = vector.load %arg10[%c0_26, %c0_27] : memref<16x128xf32, #tpu.memory_space<vmem>>, vector<2x128xf32>
    %44 = arith.addf %43, %42 : vector<2x128xf32>
    %45 = math.tanh %44 : vector<2x128xf32>
    %c0_28 = arith.constant 0 : index
    %c0_29 = arith.constant 0 : index
    %c0_30 = arith.constant 0 : index
    %46 = vector.load %arg9[%c0_28, %c0_29, %c0_30] : memref<8x2x128xf32, #tpu.memory_space<vmem>>, vector<1x2x128xf32>
    %47 = vector.shape_cast %46 : vector<1x2x128xf32> to vector<2x128xf32>
    %48 = vector.shape_cast %45 : vector<2x128xf32> to vector<1x2x128xf32>
    tpu.vector_store %arg9[%c0_28, %c0_29, %c0_30], %48 {strides = array<i32>} : memref<8x2x128xf32, #tpu.memory_space<vmem>>, vector<1x2x128xf32>,
    %c96_i32_31 = arith.constant 96 : i32
    %49 = tpu.dynamic_rotate %25 by %c96_i32_31 dim 1 : vector<2x128xf32>, i32 -> vector<2x128xf32>
    %50 = arith.select %21, %45, %49 : vector<2x128xi1>, vector<2x128xf32>
    %51 = vector.broadcast %16 : vector<1x128xf32> to vector<2x128xf32>
    %52 = arith.mulf %50, %51 : vector<2x128xf32>
    %cst_32 = arith.constant dense<0.000000e+00> : vector<2x128xf32>
    %53 = tpu.matmul %52, %17, %cst_32 {dimension_numbers = #tpu.dot_dimension_numbers<[1], [0], [0], [1], [0, 0, 1, 1], [], []>, precision = #tpu.contract_precision<fp32>} : vector<2x128xf32>, vector<128x128xf32>, vector<2x128xf32> -> vector<2x128xf32>
    %54 = vector.broadcast %18 : vector<1x128xf32> to vector<2x128xf32>
    %55 = arith.addf %53, %54 : vector<2x128xf32>
    %56 = math.absf %55 : vector<2x128xf32>
    %cst_33 = arith.constant 5.000000e-01 : f32
    %57 = vector.broadcast %cst_33 : f32 to vector<2x128xf32>
    %58 = arith.mulf %56, %57 : vector<2x128xf32>
    %59 = math.exp %58 : vector<2x128xf32>
    %c32_i32_34 = arith.constant 32 : i32
    %60 = tpu.dynamic_rotate %59 by %c32_i32_34 dim 1 : vector<2x128xf32>, i32 -> vector<2x128xf32>
    %61 = arith.addf %59, %60 : vector<2x128xf32>
    %c64_i32_35 = arith.constant 64 : i32
    %62 = tpu.dynamic_rotate %61 by %c64_i32_35 dim 1 : vector<2x128xf32>, i32 -> vector<2x128xf32>
    %63 = arith.addf %61, %62 : vector<2x128xf32>
    %64 = arith.mulf %52, %59 : vector<2x128xf32>
    %c32_i32_36 = arith.constant 32 : i32
    %65 = tpu.dynamic_rotate %64 by %c32_i32_36 dim 1 : vector<2x128xf32>, i32 -> vector<2x128xf32>
    %66 = arith.addf %64, %65 : vector<2x128xf32>
    %c64_i32_37 = arith.constant 64 : i32
    %67 = tpu.dynamic_rotate %66 by %c64_i32_37 dim 1 : vector<2x128xf32>, i32 -> vector<2x128xf32>
    %68 = arith.addf %66, %67 : vector<2x128xf32>
    %69 = arith.divf %68, %63 : vector<2x128xf32>
    %c2 = arith.constant 2 : index
    %c0_38 = arith.constant 0 : index
    %70 = vector.load %arg10[%c2, %c0_38] : memref<16x128xf32, #tpu.memory_space<vmem>>, vector<2x128xf32>
    %71 = arith.addf %70, %69 : vector<2x128xf32>
    %72 = math.tanh %71 : vector<2x128xf32>
    %c1 = arith.constant 1 : index
    %c0_39 = arith.constant 0 : index
    %c0_40 = arith.constant 0 : index
    %73 = vector.load %arg9[%c1, %c0_39, %c0_40] : memref<8x2x128xf32, #tpu.memory_space<vmem>>, vector<1x2x128xf32>
    %74 = vector.shape_cast %73 : vector<1x2x128xf32> to vector<2x128xf32>
    %75 = vector.shape_cast %72 : vector<2x128xf32> to vector<1x2x128xf32>
    tpu.vector_store %arg9[%c1, %c0_39, %c0_40], %75 {strides = array<i32>} : memref<8x2x128xf32, #tpu.memory_space<vmem>>, vector<1x2x128xf32>,
    %c96_i32_41 = arith.constant 96 : i32
    %76 = tpu.dynamic_rotate %52 by %c96_i32_41 dim 1 : vector<2x128xf32>, i32 -> vector<2x128xf32>
    %77 = arith.select %21, %72, %76 : vector<2x128xi1>, vector<2x128xf32>
    %78 = vector.broadcast %16 : vector<1x128xf32> to vector<2x128xf32>
    %79 = arith.mulf %77, %78 : vector<2x128xf32>
    %cst_42 = arith.constant dense<0.000000e+00> : vector<2x128xf32>
    %80 = tpu.matmul %79, %17, %cst_42 {dimension_numbers = #tpu.dot_dimension_numbers<[1], [0], [0], [1], [0, 0, 1, 1], [], []>, precision = #tpu.contract_precision<fp32>} : vector<2x128xf32>, vector<128x128xf32>, vector<2x128xf32> -> vector<2x128xf32>
    %81 = vector.broadcast %18 : vector<1x128xf32> to vector<2x128xf32>
    %82 = arith.addf %80, %81 : vector<2x128xf32>
    %83 = math.absf %82 : vector<2x128xf32>
    %cst_43 = arith.constant 5.000000e-01 : f32
    %84 = vector.broadcast %cst_43 : f32 to vector<2x128xf32>
    %85 = arith.mulf %83, %84 : vector<2x128xf32>
    %86 = math.exp %85 : vector<2x128xf32>
    %c32_i32_44 = arith.constant 32 : i32
    %87 = tpu.dynamic_rotate %86 by %c32_i32_44 dim 1 : vector<2x128xf32>, i32 -> vector<2x128xf32>
    %88 = arith.addf %86, %87 : vector<2x128xf32>
    %c64_i32_45 = arith.constant 64 : i32
    %89 = tpu.dynamic_rotate %88 by %c64_i32_45 dim 1 : vector<2x128xf32>, i32 -> vector<2x128xf32>
    %90 = arith.addf %88, %89 : vector<2x128xf32>
    %91 = arith.mulf %79, %86 : vector<2x128xf32>
    %c32_i32_46 = arith.constant 32 : i32
    %92 = tpu.dynamic_rotate %91 by %c32_i32_46 dim 1 : vector<2x128xf32>, i32 -> vector<2x128xf32>
    %93 = arith.addf %91, %92 : vector<2x128xf32>
    %c64_i32_47 = arith.constant 64 : i32
    %94 = tpu.dynamic_rotate %93 by %c64_i32_47 dim 1 : vector<2x128xf32>, i32 -> vector<2x128xf32>
    %95 = arith.addf %93, %94 : vector<2x128xf32>
    %96 = arith.divf %95, %90 : vector<2x128xf32>
    %c4 = arith.constant 4 : index
    %c0_48 = arith.constant 0 : index
    %97 = vector.load %arg10[%c4, %c0_48] : memref<16x128xf32, #tpu.memory_space<vmem>>, vector<2x128xf32>
    %98 = arith.addf %97, %96 : vector<2x128xf32>
    %99 = math.tanh %98 : vector<2x128xf32>
    %c2_49 = arith.constant 2 : index
    %c0_50 = arith.constant 0 : index
    %c0_51 = arith.constant 0 : index
    %100 = vector.load %arg9[%c2_49, %c0_50, %c0_51] : memref<8x2x128xf32, #tpu.memory_space<vmem>>, vector<1x2x128xf32>
    %101 = vector.shape_cast %100 : vector<1x2x128xf32> to vector<2x128xf32>
    %102 = vector.shape_cast %99 : vector<2x128xf32> to vector<1x2x128xf32>
    tpu.vector_store %arg9[%c2_49, %c0_50, %c0_51], %102 {strides = array<i32>} : memref<8x2x128xf32, #tpu.memory_space<vmem>>, vector<1x2x128xf32>,
    %c96_i32_52 = arith.constant 96 : i32
    %103 = tpu.dynamic_rotate %79 by %c96_i32_52 dim 1 : vector<2x128xf32>, i32 -> vector<2x128xf32>
    %104 = arith.select %21, %99, %103 : vector<2x128xi1>, vector<2x128xf32>
    %105 = vector.broadcast %16 : vector<1x128xf32> to vector<2x128xf32>
    %106 = arith.mulf %104, %105 : vector<2x128xf32>
    %cst_53 = arith.constant dense<0.000000e+00> : vector<2x128xf32>
    %107 = tpu.matmul %106, %17, %cst_53 {dimension_numbers = #tpu.dot_dimension_numbers<[1], [0], [0], [1], [0, 0, 1, 1], [], []>, precision = #tpu.contract_precision<fp32>} : vector<2x128xf32>, vector<128x128xf32>, vector<2x128xf32> -> vector<2x128xf32>
    %108 = vector.broadcast %18 : vector<1x128xf32> to vector<2x128xf32>
    %109 = arith.addf %107, %108 : vector<2x128xf32>
    %110 = math.absf %109 : vector<2x128xf32>
    %cst_54 = arith.constant 5.000000e-01 : f32
    %111 = vector.broadcast %cst_54 : f32 to vector<2x128xf32>
    %112 = arith.mulf %110, %111 : vector<2x128xf32>
    %113 = math.exp %112 : vector<2x128xf32>
    %c32_i32_55 = arith.constant 32 : i32
    %114 = tpu.dynamic_rotate %113 by %c32_i32_55 dim 1 : vector<2x128xf32>, i32 -> vector<2x128xf32>
    %115 = arith.addf %113, %114 : vector<2x128xf32>
    %c64_i32_56 = arith.constant 64 : i32
    %116 = tpu.dynamic_rotate %115 by %c64_i32_56 dim 1 : vector<2x128xf32>, i32 -> vector<2x128xf32>
    %117 = arith.addf %115, %116 : vector<2x128xf32>
    %118 = arith.mulf %106, %113 : vector<2x128xf32>
    %c32_i32_57 = arith.constant 32 : i32
    %119 = tpu.dynamic_rotate %118 by %c32_i32_57 dim 1 : vector<2x128xf32>, i32 -> vector<2x128xf32>
    %120 = arith.addf %118, %119 : vector<2x128xf32>
    %c64_i32_58 = arith.constant 64 : i32
    %121 = tpu.dynamic_rotate %120 by %c64_i32_58 dim 1 : vector<2x128xf32>, i32 -> vector<2x128xf32>
    %122 = arith.addf %120, %121 : vector<2x128xf32>
    %123 = arith.divf %122, %117 : vector<2x128xf32>
    %c6 = arith.constant 6 : index
    %c0_59 = arith.constant 0 : index
    %124 = vector.load %arg10[%c6, %c0_59] : memref<16x128xf32, #tpu.memory_space<vmem>>, vector<2x128xf32>
    %125 = arith.addf %124, %123 : vector<2x128xf32>
    %126 = math.tanh %125 : vector<2x128xf32>
    %c3 = arith.constant 3 : index
    %c0_60 = arith.constant 0 : index
    %c0_61 = arith.constant 0 : index
    %127 = vector.load %arg9[%c3, %c0_60, %c0_61] : memref<8x2x128xf32, #tpu.memory_space<vmem>>, vector<1x2x128xf32>
    %128 = vector.shape_cast %127 : vector<1x2x128xf32> to vector<2x128xf32>
    %129 = vector.shape_cast %126 : vector<2x128xf32> to vector<1x2x128xf32>
    tpu.vector_store %arg9[%c3, %c0_60, %c0_61], %129 {strides = array<i32>} : memref<8x2x128xf32, #tpu.memory_space<vmem>>, vector<1x2x128xf32>,
    %c96_i32_62 = arith.constant 96 : i32
    %130 = tpu.dynamic_rotate %106 by %c96_i32_62 dim 1 : vector<2x128xf32>, i32 -> vector<2x128xf32>
    %131 = arith.select %21, %126, %130 : vector<2x128xi1>, vector<2x128xf32>
    %132 = vector.broadcast %16 : vector<1x128xf32> to vector<2x128xf32>
    %133 = arith.mulf %131, %132 : vector<2x128xf32>
    %cst_63 = arith.constant dense<0.000000e+00> : vector<2x128xf32>
    %134 = tpu.matmul %133, %17, %cst_63 {dimension_numbers = #tpu.dot_dimension_numbers<[1], [0], [0], [1], [0, 0, 1, 1], [], []>, precision = #tpu.contract_precision<fp32>} : vector<2x128xf32>, vector<128x128xf32>, vector<2x128xf32> -> vector<2x128xf32>
    %135 = vector.broadcast %18 : vector<1x128xf32> to vector<2x128xf32>
    %136 = arith.addf %134, %135 : vector<2x128xf32>
    %137 = math.absf %136 : vector<2x128xf32>
    %cst_64 = arith.constant 5.000000e-01 : f32
    %138 = vector.broadcast %cst_64 : f32 to vector<2x128xf32>
    %139 = arith.mulf %137, %138 : vector<2x128xf32>
    %140 = math.exp %139 : vector<2x128xf32>
    %c32_i32_65 = arith.constant 32 : i32
    %141 = tpu.dynamic_rotate %140 by %c32_i32_65 dim 1 : vector<2x128xf32>, i32 -> vector<2x128xf32>
    %142 = arith.addf %140, %141 : vector<2x128xf32>
    %c64_i32_66 = arith.constant 64 : i32
    %143 = tpu.dynamic_rotate %142 by %c64_i32_66 dim 1 : vector<2x128xf32>, i32 -> vector<2x128xf32>
    %144 = arith.addf %142, %143 : vector<2x128xf32>
    %145 = arith.mulf %133, %140 : vector<2x128xf32>
    %c32_i32_67 = arith.constant 32 : i32
    %146 = tpu.dynamic_rotate %145 by %c32_i32_67 dim 1 : vector<2x128xf32>, i32 -> vector<2x128xf32>
    %147 = arith.addf %145, %146 : vector<2x128xf32>
    %c64_i32_68 = arith.constant 64 : i32
    %148 = tpu.dynamic_rotate %147 by %c64_i32_68 dim 1 : vector<2x128xf32>, i32 -> vector<2x128xf32>
    %149 = arith.addf %147, %148 : vector<2x128xf32>
    %150 = arith.divf %149, %144 : vector<2x128xf32>
    %c8 = arith.constant 8 : index
    %c0_69 = arith.constant 0 : index
    %151 = vector.load %arg10[%c8, %c0_69] : memref<16x128xf32, #tpu.memory_space<vmem>>, vector<2x128xf32>
    %152 = arith.addf %151, %150 : vector<2x128xf32>
    %153 = math.tanh %152 : vector<2x128xf32>
    %c4_70 = arith.constant 4 : index
    %c0_71 = arith.constant 0 : index
    %c0_72 = arith.constant 0 : index
    %154 = vector.load %arg9[%c4_70, %c0_71, %c0_72] : memref<8x2x128xf32, #tpu.memory_space<vmem>>, vector<1x2x128xf32>
    %155 = vector.shape_cast %154 : vector<1x2x128xf32> to vector<2x128xf32>
    %156 = vector.shape_cast %153 : vector<2x128xf32> to vector<1x2x128xf32>
    tpu.vector_store %arg9[%c4_70, %c0_71, %c0_72], %156 {strides = array<i32>} : memref<8x2x128xf32, #tpu.memory_space<vmem>>, vector<1x2x128xf32>,
    %c96_i32_73 = arith.constant 96 : i32
    %157 = tpu.dynamic_rotate %133 by %c96_i32_73 dim 1 : vector<2x128xf32>, i32 -> vector<2x128xf32>
    %158 = arith.select %21, %153, %157 : vector<2x128xi1>, vector<2x128xf32>
    %159 = vector.broadcast %16 : vector<1x128xf32> to vector<2x128xf32>
    %160 = arith.mulf %158, %159 : vector<2x128xf32>
    %cst_74 = arith.constant dense<0.000000e+00> : vector<2x128xf32>
    %161 = tpu.matmul %160, %17, %cst_74 {dimension_numbers = #tpu.dot_dimension_numbers<[1], [0], [0], [1], [0, 0, 1, 1], [], []>, precision = #tpu.contract_precision<fp32>} : vector<2x128xf32>, vector<128x128xf32>, vector<2x128xf32> -> vector<2x128xf32>
    %162 = vector.broadcast %18 : vector<1x128xf32> to vector<2x128xf32>
    %163 = arith.addf %161, %162 : vector<2x128xf32>
    %164 = math.absf %163 : vector<2x128xf32>
    %cst_75 = arith.constant 5.000000e-01 : f32
    %165 = vector.broadcast %cst_75 : f32 to vector<2x128xf32>
    %166 = arith.mulf %164, %165 : vector<2x128xf32>
    %167 = math.exp %166 : vector<2x128xf32>
    %c32_i32_76 = arith.constant 32 : i32
    %168 = tpu.dynamic_rotate %167 by %c32_i32_76 dim 1 : vector<2x128xf32>, i32 -> vector<2x128xf32>
    %169 = arith.addf %167, %168 : vector<2x128xf32>
    %c64_i32_77 = arith.constant 64 : i32
    %170 = tpu.dynamic_rotate %169 by %c64_i32_77 dim 1 : vector<2x128xf32>, i32 -> vector<2x128xf32>
    %171 = arith.addf %169, %170 : vector<2x128xf32>
    %172 = arith.mulf %160, %167 : vector<2x128xf32>
    %c32_i32_78 = arith.constant 32 : i32
    %173 = tpu.dynamic_rotate %172 by %c32_i32_78 dim 1 : vector<2x128xf32>, i32 -> vector<2x128xf32>
    %174 = arith.addf %172, %173 : vector<2x128xf32>
    %c64_i32_79 = arith.constant 64 : i32
    %175 = tpu.dynamic_rotate %174 by %c64_i32_79 dim 1 : vector<2x128xf32>, i32 -> vector<2x128xf32>
    %176 = arith.addf %174, %175 : vector<2x128xf32>
    %177 = arith.divf %176, %171 : vector<2x128xf32>
    %c10 = arith.constant 10 : index
    %c0_80 = arith.constant 0 : index
    %178 = vector.load %arg10[%c10, %c0_80] : memref<16x128xf32, #tpu.memory_space<vmem>>, vector<2x128xf32>
    %179 = arith.addf %178, %177 : vector<2x128xf32>
    %180 = math.tanh %179 : vector<2x128xf32>
    %c5 = arith.constant 5 : index
    %c0_81 = arith.constant 0 : index
    %c0_82 = arith.constant 0 : index
    %181 = vector.load %arg9[%c5, %c0_81, %c0_82] : memref<8x2x128xf32, #tpu.memory_space<vmem>>, vector<1x2x128xf32>
    %182 = vector.shape_cast %181 : vector<1x2x128xf32> to vector<2x128xf32>
    %183 = vector.shape_cast %180 : vector<2x128xf32> to vector<1x2x128xf32>
    tpu.vector_store %arg9[%c5, %c0_81, %c0_82], %183 {strides = array<i32>} : memref<8x2x128xf32, #tpu.memory_space<vmem>>, vector<1x2x128xf32>,
    %c96_i32_83 = arith.constant 96 : i32
    %184 = tpu.dynamic_rotate %160 by %c96_i32_83 dim 1 : vector<2x128xf32>, i32 -> vector<2x128xf32>
    %185 = arith.select %21, %180, %184 : vector<2x128xi1>, vector<2x128xf32>
    %186 = vector.broadcast %16 : vector<1x128xf32> to vector<2x128xf32>
    %187 = arith.mulf %185, %186 : vector<2x128xf32>
    %cst_84 = arith.constant dense<0.000000e+00> : vector<2x128xf32>
    %188 = tpu.matmul %187, %17, %cst_84 {dimension_numbers = #tpu.dot_dimension_numbers<[1], [0], [0], [1], [0, 0, 1, 1], [], []>, precision = #tpu.contract_precision<fp32>} : vector<2x128xf32>, vector<128x128xf32>, vector<2x128xf32> -> vector<2x128xf32>
    %189 = vector.broadcast %18 : vector<1x128xf32> to vector<2x128xf32>
    %190 = arith.addf %188, %189 : vector<2x128xf32>
    %191 = math.absf %190 : vector<2x128xf32>
    %cst_85 = arith.constant 5.000000e-01 : f32
    %192 = vector.broadcast %cst_85 : f32 to vector<2x128xf32>
    %193 = arith.mulf %191, %192 : vector<2x128xf32>
    %194 = math.exp %193 : vector<2x128xf32>
    %c32_i32_86 = arith.constant 32 : i32
    %195 = tpu.dynamic_rotate %194 by %c32_i32_86 dim 1 : vector<2x128xf32>, i32 -> vector<2x128xf32>
    %196 = arith.addf %194, %195 : vector<2x128xf32>
    %c64_i32_87 = arith.constant 64 : i32
    %197 = tpu.dynamic_rotate %196 by %c64_i32_87 dim 1 : vector<2x128xf32>, i32 -> vector<2x128xf32>
    %198 = arith.addf %196, %197 : vector<2x128xf32>
    %199 = arith.mulf %187, %194 : vector<2x128xf32>
    %c32_i32_88 = arith.constant 32 : i32
    %200 = tpu.dynamic_rotate %199 by %c32_i32_88 dim 1 : vector<2x128xf32>, i32 -> vector<2x128xf32>
    %201 = arith.addf %199, %200 : vector<2x128xf32>
    %c64_i32_89 = arith.constant 64 : i32
    %202 = tpu.dynamic_rotate %201 by %c64_i32_89 dim 1 : vector<2x128xf32>, i32 -> vector<2x128xf32>
    %203 = arith.addf %201, %202 : vector<2x128xf32>
    %204 = arith.divf %203, %198 : vector<2x128xf32>
    %c12 = arith.constant 12 : index
    %c0_90 = arith.constant 0 : index
    %205 = vector.load %arg10[%c12, %c0_90] : memref<16x128xf32, #tpu.memory_space<vmem>>, vector<2x128xf32>
    %206 = arith.addf %205, %204 : vector<2x128xf32>
    %207 = math.tanh %206 : vector<2x128xf32>
    %c6_91 = arith.constant 6 : index
    %c0_92 = arith.constant 0 : index
    %c0_93 = arith.constant 0 : index
    %208 = vector.load %arg9[%c6_91, %c0_92, %c0_93] : memref<8x2x128xf32, #tpu.memory_space<vmem>>, vector<1x2x128xf32>
    %209 = vector.shape_cast %208 : vector<1x2x128xf32> to vector<2x128xf32>
    %210 = vector.shape_cast %207 : vector<2x128xf32> to vector<1x2x128xf32>
    tpu.vector_store %arg9[%c6_91, %c0_92, %c0_93], %210 {strides = array<i32>} : memref<8x2x128xf32, #tpu.memory_space<vmem>>, vector<1x2x128xf32>,
    %c96_i32_94 = arith.constant 96 : i32
    %211 = tpu.dynamic_rotate %187 by %c96_i32_94 dim 1 : vector<2x128xf32>, i32 -> vector<2x128xf32>
    %212 = arith.select %21, %207, %211 : vector<2x128xi1>, vector<2x128xf32>
    %213 = vector.broadcast %16 : vector<1x128xf32> to vector<2x128xf32>
    %214 = arith.mulf %212, %213 : vector<2x128xf32>
    %cst_95 = arith.constant dense<0.000000e+00> : vector<2x128xf32>
    %215 = tpu.matmul %214, %17, %cst_95 {dimension_numbers = #tpu.dot_dimension_numbers<[1], [0], [0], [1], [0, 0, 1, 1], [], []>, precision = #tpu.contract_precision<fp32>} : vector<2x128xf32>, vector<128x128xf32>, vector<2x128xf32> -> vector<2x128xf32>
    %216 = vector.broadcast %18 : vector<1x128xf32> to vector<2x128xf32>
    %217 = arith.addf %215, %216 : vector<2x128xf32>
    %218 = math.absf %217 : vector<2x128xf32>
    %cst_96 = arith.constant 5.000000e-01 : f32
    %219 = vector.broadcast %cst_96 : f32 to vector<2x128xf32>
    %220 = arith.mulf %218, %219 : vector<2x128xf32>
    %221 = math.exp %220 : vector<2x128xf32>
    %c32_i32_97 = arith.constant 32 : i32
    %222 = tpu.dynamic_rotate %221 by %c32_i32_97 dim 1 : vector<2x128xf32>, i32 -> vector<2x128xf32>
    %223 = arith.addf %221, %222 : vector<2x128xf32>
    %c64_i32_98 = arith.constant 64 : i32
    %224 = tpu.dynamic_rotate %223 by %c64_i32_98 dim 1 : vector<2x128xf32>, i32 -> vector<2x128xf32>
    %225 = arith.addf %223, %224 : vector<2x128xf32>
    %226 = arith.mulf %214, %221 : vector<2x128xf32>
    %c32_i32_99 = arith.constant 32 : i32
    %227 = tpu.dynamic_rotate %226 by %c32_i32_99 dim 1 : vector<2x128xf32>, i32 -> vector<2x128xf32>
    %228 = arith.addf %226, %227 : vector<2x128xf32>
    %c64_i32_100 = arith.constant 64 : i32
    %229 = tpu.dynamic_rotate %228 by %c64_i32_100 dim 1 : vector<2x128xf32>, i32 -> vector<2x128xf32>
    %230 = arith.addf %228, %229 : vector<2x128xf32>
    %231 = arith.divf %230, %225 : vector<2x128xf32>
    %c14 = arith.constant 14 : index
    %c0_101 = arith.constant 0 : index
    %232 = vector.load %arg10[%c14, %c0_101] : memref<16x128xf32, #tpu.memory_space<vmem>>, vector<2x128xf32>
    %233 = arith.addf %232, %231 : vector<2x128xf32>
    %234 = math.tanh %233 : vector<2x128xf32>
    %c7 = arith.constant 7 : index
    %c0_102 = arith.constant 0 : index
    %c0_103 = arith.constant 0 : index
    %235 = vector.load %arg9[%c7, %c0_102, %c0_103] : memref<8x2x128xf32, #tpu.memory_space<vmem>>, vector<1x2x128xf32>
    %236 = vector.shape_cast %235 : vector<1x2x128xf32> to vector<2x128xf32>
    %237 = vector.shape_cast %234 : vector<2x128xf32> to vector<1x2x128xf32>
    tpu.vector_store %arg9[%c7, %c0_102, %c0_103], %237 {strides = array<i32>} : memref<8x2x128xf32, #tpu.memory_space<vmem>>, vector<1x2x128xf32>,
    return
  }
}

</mosaic_0001>

<bundles_post_ra>
// kernel: tpu_custom_call.1
= control target key start
LH: loop header
LB: loop body
LE: loop exit
PB: predicated region body
PF: predicated region fallthrough
CT: control target
= control target key end

     0   :  { %14 = vsyncpa [#allocation4], 0  ;;  %s12320_s0 = inlined_call_operand.hbm [shape: f32[16,32], index: 0, kind: input, shape index: {}]   ;;  %s12321_s1 = inlined_call_operand.vmem [shape: f32[2,128], index: 1, kind: input, shape index: {}]   ;;  %s12322_s2 = inlined_call_operand.hbm [shape: f32[128,128], index: 2, kind: input, shape index: {}]   ;;  %s12323_s3 = inlined_call_operand.vmem [shape: f32[1,128], index: 3, kind: input, shape index: {}]   ;;  %s12324_s4 = inlined_call_operand.vmem [shape: f32[1,128], index: 4, kind: input, shape index: {}]   ;;  %s12325_s5 = inlined_call_operand.hbm [shape: f32[32,32], index: 5, kind: input, shape index: {}]   ;;  %s12326_s6 = inlined_call_operand.vmem [shape: f32[1,32], index: 6, kind: input, shape index: {}]   ;;  %s12327_s7 = inlined_call_operand.hbm [shape: f32[32,128], index: 7, kind: input, shape index: {}]   ;;  %s12328_s8 = inlined_call_operand.vmem [shape: f32[1,128], index: 8, kind: input, shape index: {}]   ;;  %s12329_s9 = inlined_call_operand.hbm [shape: f32[8,2,128], index: 9, kind: output, shape index: {}]  }
   0x1   :  { %15 = vsyncpa [#allocation7], 0 }
   0x2   :  { %16 = vsyncpa [#allocation10], 0 }
   0x3   :  { %17 = vsyncpa [#allocation5], 0  ;;  %s10838_s30 = smov [#allocation6]   ;;  %s10839_s11 = smov [#allocation3]  }
   0x4   :  { %s37_s10 = sshll.u32 %s10838_s30, 4  ;;  %s23_s12 = sshll.u32 %s10839_s11, 4  ;;  %s38_s10 = int_to_ptr.vmem [resolvable:$true] %s37_s10  ;;  %s10902_s12 = int_to_ptr.vmem [resolvable:$true] %s23_s12 }
   0x5   :  { %s10720_s15 = scalar_lea.hbm %s12322_s2, 2048 }
   0x6   :  { %p10721_p0 = scmp.ne.s32.totalorder %s12322_s2, %s10720_s15  ;;  %p10724_p1 = scmp.lt.u32.totalorder %s10720_s15, %s12322_s2 }
   0x8   :  { %p10726_p2 = pnand %p10724_p1, %p10721_p0 }
   0xa   :  { %10729 = shalt.err (!%p10726_p2)
}
   0xb   :  { %s10730_s20 = scalar_lea.vmem %s38_s10, 2048  ;;  %p10735_p4 = scmp.lt.s32.totalorder %s38_s10, %s38_s10 }
   0xc   :  { %p10731_p3 = scmp.ne.s32.totalorder %s38_s10, %s10730_s20  ;;  %p10736_p5 = scmp.lt.s32.totalorder %s10730_s20, %s10730_s20 }
   0xe   :  { %p10737_p6 = por %p10736_p5, %p10735_p4 }
  0x10   :  { %p10738_p7 = pnand %p10737_p6, %p10731_p3 }
  0x12   :  { %10741 = shalt.err (!%p10738_p7)
}
  0x13   :  { %s10840_s21 = smov 128   ;;  %s10841_s22 = smov 8  }
  0x14   :  { %43 = dma.hbm_to_vmem [thread:$0]  %s12322_s2, 2048, %s38_s10, [#allocation7], %s10840_s21, %s10840_s21, %s10841_s22  }
  0x15   :  { %s10742_s27 = scalar_lea.hbm %s12320_s0, 256 }
  0x16   :  { %p10743_p8 = scmp.ne.s32.totalorder %s12320_s0, %s10742_s27  ;;  %p10746_p9 = scmp.lt.u32.totalorder %s10742_s27, %s12320_s0 }
  0x18   :  { %p10748_p10 = pnand %p10746_p9, %p10743_p8 }
  0x1a   :  { %10751 = shalt.err (!%p10748_p10)
}
  0x1b   :  { %s10752_s13 = scalar_lea.vmem %s10902_s12, 256  ;;  %p10757_p12 = scmp.lt.s32.totalorder %s10902_s12, %s10902_s12 }
  0x1c   :  { %p10753_p11 = scmp.ne.s32.totalorder %s10902_s12, %s10752_s13  ;;  %p10758_p13 = scmp.lt.s32.totalorder %s10752_s13, %s10752_s13 }
  0x1e   :  { %p10759_p0 = por %p10758_p13, %p10757_p12 }
  0x20   :  { %p10760_p1 = pnand %p10759_p0, %p10753_p11 }
  0x22   :  { %10763 = shalt.err (!%p10760_p1)
}
  0x23   :  { %29 = dma.hbm_to_vmem [thread:$0]  %s12320_s0, 256, %s10902_s12, [#allocation4], %s10840_s21, %s10840_s21, %s10841_s22  }
  0x24   :  { %s10842_s14 = smov [#allocation8]   ;;  %s10843_s16 = smov [#allocation9]  }
  0x25   :  { %s53_s15 = sshll.u32 %s10842_s14, 4  ;;  %s67_s17 = sshll.u32 %s10843_s16, 4  ;;  %s54_s15 = int_to_ptr.vmem [resolvable:$true] %s53_s15  ;;  %s10939_s17 = int_to_ptr.vmem [resolvable:$true] %s67_s17 }
  0x26   :  { %s10764_s20 = scalar_lea.hbm %s12325_s5, 512 }
  0x27   :  { %p10765_p2 = scmp.ne.s32.totalorder %s12325_s5, %s10764_s20  ;;  %p10768_p3 = scmp.lt.u32.totalorder %s10764_s20, %s12325_s5 }
  0x29   :  { %p10770_p4 = pnand %p10768_p3, %p10765_p2 }
  0x2b   :  { %10773 = shalt.err (!%p10770_p4)
}
  0x2c   :  { %s10774_s0 = scalar_lea.vmem %s54_s15, 512  ;;  %p10779_p6 = scmp.lt.s32.totalorder %s54_s15, %s54_s15 }
  0x2d   :  { %p10775_p5 = scmp.ne.s32.totalorder %s54_s15, %s10774_s0  ;;  %p10780_p7 = scmp.lt.s32.totalorder %s10774_s0, %s10774_s0 }
  0x2f   :  { %p10781_p8 = por %p10780_p7, %p10779_p6 }
  0x31   :  { %p10782_p9 = pnand %p10781_p8, %p10775_p5 }
  0x33   :  { %10785 = shalt.err (!%p10782_p9)
}
  0x34   :  { %59 = dma.hbm_to_vmem [thread:$0]  %s12325_s5, 512, %s54_s15, [#allocation7], %s10840_s21, %s10840_s21, %s10841_s22  }
  0x35   :  { %s10786_s30 = scalar_lea.hbm %s12327_s7, 512 }
  0x36   :  { %p10787_p10 = scmp.ne.s32.totalorder %s12327_s7, %s10786_s30  ;;  %p10790_p11 = scmp.lt.u32.totalorder %s10786_s30, %s12327_s7 }
  0x38   :  { %p10792_p12 = pnand %p10790_p11, %p10787_p10 }
  0x3a   :  { %10795 = shalt.err (!%p10792_p12)
}
  0x3b   :  { %s10796_s14 = scalar_lea.vmem %s10939_s17, 512  ;;  %p10801_p0 = scmp.lt.s32.totalorder %s10939_s17, %s10939_s17 }
  0x3c   :  { %p10797_p13 = scmp.ne.s32.totalorder %s10939_s17, %s10796_s14  ;;  %p10802_p1 = scmp.lt.s32.totalorder %s10796_s14, %s10796_s14 }
  0x3e   :  { %p10803_p2 = por %p10802_p1, %p10801_p0 }
  0x40   :  { %p10804_p3 = pnand %p10803_p2, %p10797_p13 }
  0x42   :  { %10807 = shalt.err (!%p10804_p3)
}
  0x43   :  { %73 = dma.hbm_to_vmem [thread:$0]  %s12327_s7, 512, %s10939_s17, [#allocation10], %s10840_s21, %s10840_s21, %s10841_s22  }
  0x44   :  { %10830 = dma.done.wait [#allocation4], 256  }
  0x45   :  { %10831 = vsyncadd [#allocation4], 4294967040 }
  0x46   :  { %10832 = dma.done.wait [#allocation7], 2560  }
  0x47   :  { %10833 = vsyncadd [#allocation7], 4294964736 }
  0x48   :  { %10834 = dma.done.wait [#allocation10], 512  }
  0x49   :  { %10835 = vsyncadd [#allocation10], 4294966784  ;;  %vm101_vm0 = vcmask 261120   ;;  %v90_v0 = vld [vmem:[#allocation8] sm:$0xff]  ;;  %v91_v1 = vld [vmem:[#allocation8 + $0x8] sm:$0xff]  ;;  %vm10845_vm1 = vmmov 0  }
  0x4a   :  { %v92_v2 = vld [vmem:[#allocation8 + $0x10] sm:$0xff]  ;;  %v109_v3 = vand.u32 4294901760, %v90_v0  ;;  %v112_v4 = vand.u32 4294901760, %v91_v1  ;;  %v93_v5 = vld [vmem:[#allocation8 + $0x18] sm:$0xff]  ;;  %v1188_v46 = vld [vmem:[#allocation6] sm:$0xff]  ;;  %s10847_s19 = smov 32  }
  0x4b   :  { %v115_v6 = vand.u32 4294901760, %v92_v2  ;;  %v88_v7 = vld [vmem:[#allocation3] sm:$0xff]  ;;  %v89_v8 = vld [vmem:[#allocation3 + $0x8] sm:$0xff]  ;;  %v118_v9 = vand.u32 4294901760, %v93_v5  ;;  %v1189_v47 = vld [vmem:[#allocation6 + $0x8] sm:$0xff]  ;;  %v1224_v48 = vand.u32 4294901760, %v1188_v46 }
  0x4c   :  { %v103_v10 = vsel %vm101_vm0, %v88_v7, 0  ;;  %v106_v11 = vsel %vm101_vm0, %v89_v8, 0  ;;  %v10978_v12 = vpack.c.bf16 %v112_v4, %v109_v3  ;;  %v199_v15 = vsub.f32 %v90_v0, %v109_v3  ;;  %v1190_v50 = vld [vmem:[#allocation6 + $0x10] sm:$0xff]  ;;  %v1191_v51 = vld [vmem:[#allocation6 + $0x18] sm:$0xff]  ;;  %v1208_v52 = vld [vmem:[%s12321_s1] sm:$0x3] }
  0x4d   :  { %v10980_v13 = vand.u32 4294901760, %v103_v10  ;;  %v10982_v14 = vand.u32 4294901760, %v106_v11  ;;  %v10984_v16 = vpack.c.bf16 %v118_v9, %v115_v6  ;;  %v206_v17 = vsub.f32 %v91_v1, %v112_v4  ;;  %v1192_v57 = vld [vmem:[#allocation6 + $0x20] sm:$0xff]  ;;  %v1193_v58 = vld [vmem:[#allocation6 + $0x28] sm:$0xff]  ;;  %v1194_v3 = vld [vmem:[#allocation6 + $0x30] sm:$0xff]  ;;  %s10848_s20 = smov 96  }
  0x4e   :  { %v213_v18 = vsub.f32 %v92_v2, %v115_v6  ;;  %v220_v19 = vsub.f32 %v93_v5, %v118_v9  ;;  %9294 = vmatprep.subr.bf16.mxu0 %v10978_v12  ;;  %v200_v22 = vand.u32 4294901760, %v199_v15  ;;  %v1227_v49 = vand.u32 4294901760, %v1189_v47  ;;  %v1195_v4 = vld [vmem:[#allocation6 + $0x38] sm:$0xff]  ;;  %s10849_s25 = smov 64  }
  0x4f   :  { %v178_v20 = vsub.f32 %v103_v10, %v10980_v13  ;;  %v188_v21 = vsub.f32 %v106_v11, %v10982_v14  ;;  %9296 = vmatpush3.bf16.msra.mxu0 %v10978_v12  ;;  %v207_v23 = vand.u32 4294901760, %v206_v17  ;;  %v9309_v42 = vpack.c.bf16 %v206_v17, %v199_v15 }
  0x50   :  { %v214_v24 = vand.u32 4294901760, %v213_v18  ;;  %v221_v25 = vand.u32 4294901760, %v220_v19  ;;  %9298 = vmatprep.subr.bf16.mxu0 %v10984_v16  ;;  %v201_v28 = vsub.f32 %v199_v15, %v200_v22  ;;  %v9313_v43 = vpack.c.bf16 %v220_v19, %v213_v18  ;;  %v1196_v15 = vld [vmem:[#allocation6 + $0x40] sm:$0xff] }
  0x51   :  { %v179_v26 = vand.u32 4294901760, %v178_v20  ;;  %v189_v27 = vand.u32 4294901760, %v188_v21  ;;  %v208_v29 = vsub.f32 %v206_v17, %v207_v23  ;;  %v9325_v44 = vpack.c.bf16 %v207_v23, %v200_v22  ;;  %v11058_v23 = vld [vmem:[%s12324_s4] ss:$0 sm:$0xff] }
  0x52   :  { %v215_v30 = vsub.f32 %v213_v18, %v214_v24  ;;  %v222_v31 = vsub.f32 %v220_v19, %v221_v25  ;;  %v202_v34 = vand.u32 4294901760, %v201_v28  ;;  %v9329_v45 = vpack.c.bf16 %v221_v25, %v214_v24  ;;  %v1199_v28 = vld [vmem:[#allocation6 + $0x58] sm:$0xff] }
  0x53   :  { %v180_v32 = vsub.f32 %v178_v20, %v179_v26  ;;  %v190_v33 = vsub.f32 %v188_v21, %v189_v27  ;;  %9300 = vmatpush3.bf16.msra.mxu0 %v10984_v16  ;;  %v209_v35 = vand.u32 4294901760, %v208_v29  ;;  %v11006_v53 = vsub.f32 %v1188_v46, %v1224_v48 }
  0x54   :  { %v216_v36 = vand.u32 4294901760, %v215_v30  ;;  %v223_v37 = vand.u32 4294901760, %v222_v31  ;;  %v11008_v54 = vsub.f32 %v1189_v47, %v1227_v49  ;;  %v1230_v55 = vand.u32 4294901760, %v1190_v50 }
  0x55   :  { %v181_v38 = vand.u32 4294901760, %v180_v32  ;;  %v191_v39 = vand.u32 4294901760, %v190_v33  ;;  %v9301_v40 = vpack.c.bf16 %v209_v35, %v202_v34  ;;  %v1233_v56 = vand.u32 4294901760, %v1191_v51 }
  0x56   :  { %v9305_v41 = vpack.c.bf16 %v223_v37, %v216_v36  ;;  %10667 = vtanh.f32 %v1208_v52  ;;  %v11011_v59 = vsub.f32 %v1190_v50, %v1230_v55  ;;  %v11016_v61 = vpack.c.bf16 %v1227_v49, %v1224_v48  ;;  %v1200_v37 = vld [vmem:[#allocation6 + $0x60] sm:$0xff]  ;;  %v1202_v49 = vld [vmem:[#allocation6 + $0x70] sm:$0xff]  ;;  %v1203_v50 = vld [vmem:[#allocation6 + $0x78] sm:$0xff] }
  0x57   :  { %7489 = vmatprep.mubr.f32.mxu0 %v181_v38  ;;  %9302 = vmatprep.subr.bf16.mxu0 %v9301_v40  ;;  %v11013_v60 = vsub.f32 %v1191_v51, %v1233_v56  ;;  %v1317_v62 = vand.u32 4294901760, %v11006_v53  ;;  %v1324_v63 = vand.u32 4294901760, %v11008_v54  ;;  %v10844_v0 = vmov 0.0|0.0  }
  0x58   :  { %7490 = vmatmul.mubr.f32.vlgmr.msra.gmra.mrb[0].mxu0 %v191_v39  ;;  %v1236_v1 = vand.u32 4294901760, %v1192_v57  ;;  %v1239_v2 = vand.u32 4294901760, %v1193_v58  ;;  %v1331_v6 = vand.u32 4294901760, %v11011_v59  ;;  %v11035_v10 = vpack.c.bf16 %v1233_v56, %v1230_v55  ;;  %v1201_v39 = vld [vmem:[#allocation6 + $0x68] sm:$0xff] }
  0x59   :  { %9304 = vmatpush3.bf16.msra.mxu0 %v9301_v40  ;;  %7500 = vmatprep.mubr.f32.mxu0 %v10980_v13  ;;  %v11025_v5 = vpack.c.bf16 %v1324_v63, %v1317_v62  ;;  %v1338_v7 = vand.u32 4294901760, %v11013_v60  ;;  %v1242_v11 = vand.u32 4294901760, %v1194_v3  ;;  %v1248_v24 = vand.u32 4294901760, %v1196_v15 }
  0x5a   :  { %9306 = vmatprep.subr.bf16.mxu0 %v9305_v41  ;;  %v11030_v8 = vsub.f32 %v1192_v57, %v1236_v1  ;;  %v11032_v9 = vsub.f32 %v1193_v58, %v1239_v2  ;;  %v11053_v22 = vpack.c.bf16 %v1239_v2, %v1236_v1  ;;  %v1257_v36 = vand.u32 4294901760, %v1199_v28 }
  0x5b   :  { %v11046_v17 = vsub.f32 %v1194_v3, %v1242_v11  ;;  %v11072_v32 = vsub.f32 %v1196_v15, %v1248_v24  ;;  %v1260_v46 = vand.u32 4294901760, %v1200_v37  ;;  %v1263_v47 = vand.u32 4294901760, %v1201_v39 }
  0x5c   :  { %v1345_v18 = vand.u32 4294901760, %v11030_v8  ;;  %v1352_v19 = vand.u32 4294901760, %v11032_v9  ;;  %v1266_v1 = vand.u32 4294901760, %v1202_v49  ;;  %v1269_v2 = vand.u32 4294901760, %v1203_v50 }
  0x5d   :  { %9308 = vmatpush3.bf16.msra.mxu0 %v9305_v41  ;;  %v1359_v29 = vand.u32 4294901760, %v11046_v17  ;;  %v11105_v51 = vsub.f32 %v1200_v37, %v1260_v46  ;;  %v11113_v57 = vsub.f32 %v1201_v39, %v1263_v47 }
  0x5e   :  { %9310 = vmatprep.subr.bf16.mxu0 %v9309_v42  ;;  %v11124_v15 = vsub.f32 %v1202_v49, %v1266_v1 }
  0x60   :  { %7501 = vmatmul.mubr.f32.vlgmr.msra.gmra.mrb[0].mxu0 %v10982_v14 }
  0x61   :  { %9312 = vmatpush3.bf16.msra.mxu0 %v9309_v42  ;;  %7511 = vmatprep.mubr.f32.mxu0 %v178_v20  ;;  %v1373_v42 = vand.u32 4294901760, %v11072_v32 }
  0x62   :  { %9314 = vmatprep.subr.bf16.mxu0 %v9313_v43 }
  0x65   :  { %9316 = vmatpush3.bf16.msra.mxu0 %v9313_v43 }
  0x66   :  { %9318 = vmatprep.subr.bf16.mxu0 %v10978_v12 }
  0x68   :  { %7512 = vmatmul.mubr.f32.vlgmr.msra.gmra.mrb[0].mxu0 %v188_v21  ;;  %v10668_v21 = vpop.eup %10667 }
  0x69   :  { %9320 = vmatpush3.bf16.msra.mxu0 %v10978_v12  ;;  %7522 = vmatprep.mubr.f32.mxu0 %v179_v26  ;;  %v1198_v26 = vld [vmem:[#allocation6 + $0x50] sm:$0xff]  ;;  %v11069_v30 = vmul.f32 %v10668_v21, %v11058_v23  ;;  %v11129_v21 = vpack.c.bf16 %v1263_v47, %v1260_v46  ;;  %v1339_v46 = vsub.f32 %v11013_v60, %v1338_v7 }
  0x6a   :  { %9322 = vmatprep.subr.bf16.mxu0 %v10984_v16  ;;  %v1254_v35 = vand.u32 4294901760, %v1198_v26 }
  0x6b   :  { %v11089_v41 = vand.u32 4294901760, %v11069_v30 }
  0x6c   :  { %v11086_v40 = vsub.f32 %v1198_v26, %v1254_v35  ;;  %v11116_v58 = vpack.c.bf16 %v1257_v36, %v1254_v35 }
  0x6d   :  { %9324 = vmatpush3.bf16.msra.mxu0 %v10984_v16  ;;  %v11109_v52 = vsub.f32 %v11069_v30, %v11089_v41 }
  0x6e   :  { %9326 = vmatprep.subr.bf16.mxu0 %v9325_v44  ;;  %v1387_v55 = vand.u32 4294901760, %v11086_v40 }
  0x70   :  { %7523 = vmatmul.mubr.f32.vlgmr.msra.gmra.mrb[0].mxu0 %v189_v27  ;;  %v11065_v27 = vpack.c.bf16 %v1352_v19, %v1345_v18 }
  0x71   :  { %9328 = vmatpush3.bf16.msra.mxu0 %v9325_v44  ;;  %7533 = vmatprep.mubr.f32.mxu0 %v10980_v13  ;;  %v11093_v44 = vsub.f32 %v1199_v28, %v1257_v36  ;;  %v11140_v28 = vpack.c.bf16 %v1269_v2, %v1266_v1  ;;  %v1415_v36 = vand.u32 4294901760, %v11124_v15 }
  0x72   :  { %9330 = vmatprep.subr.bf16.mxu0 %v9329_v45 }
  0x73   :  { %v1394_v56 = vand.u32 4294901760, %v11093_v44 }
  0x75   :  { %9332 = vmatpush3.bf16.msra.mxu0 %v9329_v45  ;;  %v11119_v3 = vpack.c.bf16 %v1394_v56, %v1387_v55 }
  0x76   :  { %9334 = vmatprep.subr.bf16.mxu0 %v10978_v12 }
  0x78   :  { %7534 = vmatmul.mubr.f32.vlgmr.msra.gmra.mrb[0].mxu0 %v10982_v14 }
  0x79   :  { %9336 = vmatpush3.bf16.msra.mxu0 %v10978_v12  ;;  %7544 = vmatprep.mubr.f32.mxu0 %v10980_v13  ;;  %v10846_v12 = vmov 0.0   ;;  %v1245_v13 = vand.u32 4294901760, %v1195_v4 }
  0x7a   :  { %9338 = vmatprep.subr.bf16.mxu0 %v10984_v16 }
  0x7b   :  { %v11050_v20 = vsub.f32 %v1195_v4, %v1245_v13  ;;  %v11077_v34 = vpack.c.bf16 %v1245_v13, %v1242_v11  ;;  %v1401_v4 = vand.u32 4294901760, %v11105_v51  ;;  %v1306_v11 = vand.u32 4294901760, %v11109_v52 }
  0x7c   :  { %v1408_v13 = vand.u32 4294901760, %v11113_v57 }
  0x7d   :  { %9340 = vmatpush3.bf16.msra.mxu0 %v10984_v16  ;;  %v1197_v16 = vld [vmem:[#allocation6 + $0x48] sm:$0xff]  ;;  %v1366_v31 = vand.u32 4294901760, %v11050_v20  ;;  %v1307_v35 = vsub.f32 %v11109_v52, %v1306_v11 }
  0x7e   :  { %9389 = vmatprep.subr.bf16.mxu0 %v10844_v0  ;;  %v1251_v25 = vand.u32 4294901760, %v1197_v16  ;;  %v11138_v26 = vpack.c.bf16 %v1408_v13, %v1401_v4 }
  0x7f   :  { %v11084_v38 = vpack.c.bf16 %v1366_v31, %v1359_v29  ;;  %v1308_v49 = vand.u32 4294901760, %v1307_v35 }
  0x80   :  { %7545 = vmatmul.mubr.f32.vlgmr.msra.gmra.mrb[0].mxu0 %v10982_v14  ;;  %v11044_v14 = vpack.c.bf16 %v1338_v7, %v1331_v6  ;;  %v11074_v33 = vsub.f32 %v1197_v16, %v1251_v25  ;;  %v11096_v45 = vpack.c.bf16 %v1251_v25, %v1248_v24  ;;  %v11126_v16 = vsub.f32 %v1203_v50, %v1269_v2 }
  0x81   :  { %9391 = vmatpush3.bf16.msra.mxu0 %v11016_v61  ;;  %7645 = vmatprep.mubr.msk.f32.mxu0 %vm10845_vm1, %v10846_v12  ;;  %v1318_v24 = vsub.f32 %v11006_v53, %v1317_v62  ;;  %v1325_v25 = vsub.f32 %v11008_v54, %v1324_v63  ;;  %v1332_v63 = vsub.f32 %v11011_v59, %v1331_v6 }
  0x82   :  { %9392 = vmatprep.subr.bf16.mxu0 %v10844_v0  ;;  %v1380_v43 = vand.u32 4294901760, %v11074_v33  ;;  %v1422_v37 = vand.u32 4294901760, %v11126_v16  ;;  %v1346_v50 = vsub.f32 %v11030_v8, %v1345_v18  ;;  %v1353_v6 = vsub.f32 %v11032_v9, %v1352_v19 }
  0x83   :  { %v1319_v62 = vand.u32 4294901760, %v1318_v24  ;;  %v1326_v39 = vand.u32 4294901760, %v1325_v25  ;;  %v1333_v2 = vand.u32 4294901760, %v1332_v63  ;;  %v1340_v24 = vand.u32 4294901760, %v1339_v46 }
  0x84   :  { %v11103_v48 = vpack.c.bf16 %v1380_v43, %v1373_v42  ;;  %v11155_v47 = vpack.c.bf16 %v1422_v37, %v1415_v36  ;;  %v1360_v7 = vsub.f32 %v11046_v17, %v1359_v29  ;;  %v1367_v18 = vsub.f32 %v11050_v20, %v1366_v31 }
  0x85   :  { %9394 = vmatpush3.bf16.msra.mxu0 %v11035_v10  ;;  %v11161_v1 = vpack.c.bf16 %v1326_v39, %v1319_v62  ;;  %v11174_v25 = vpack.c.bf16 %v1340_v24, %v1333_v2  ;;  %v1347_v35 = vand.u32 4294901760, %v1346_v50  ;;  %v1354_v62 = vand.u32 4294901760, %v1353_v6 }
  0x86   :  { %9395 = vmatprep.subr.bf16.mxu0 %v10844_v0  ;;  %v1361_v19 = vand.u32 4294901760, %v1360_v7  ;;  %v1368_v39 = vand.u32 4294901760, %v1367_v18  ;;  %v1374_v31 = vsub.f32 %v11072_v32, %v1373_v42  ;;  %v1381_v63 = vsub.f32 %v11074_v33, %v1380_v43 }
  0x87   :  { %v11180_v29 = vpack.c.bf16 %v1354_v62, %v1347_v35  ;;  %v1388_v2 = vsub.f32 %v11086_v40, %v1387_v55  ;;  %v1395_v24 = vsub.f32 %v11093_v44, %v1394_v56  ;;  %v1402_v42 = vsub.f32 %v11105_v51, %v1401_v4 }
  0x88   :  { %v11189_v46 = vpack.c.bf16 %v1368_v39, %v1361_v19  ;;  %v1382_v50 = vand.u32 4294901760, %v1381_v63  ;;  %v1409_v18 = vsub.f32 %v11113_v57, %v1408_v13  ;;  %v1416_v62 = vsub.f32 %v11124_v15, %v1415_v36 }
  0x89   :  { %9397 = vmatpush3.bf16.msra.mxu0 %v11053_v22  ;;  %v1389_v43 = vand.u32 4294901760, %v1388_v2  ;;  %v1396_v7 = vand.u32 4294901760, %v1395_v24  ;;  %v1403_v35 = vand.u32 4294901760, %v1402_v42  ;;  %v1423_v4 = vsub.f32 %v11126_v16, %v1422_v37 }
  0x8a   :  { %9398 = vmatprep.subr.bf16.mxu0 %v10844_v0  ;;  %v1410_v56 = vand.u32 4294901760, %v1409_v18  ;;  %v1417_v39 = vand.u32 4294901760, %v1416_v62  ;;  %v11218_v36 = vpack.c.bf16 %v11008_v54, %v11006_v53  ;;  %v11225_v37 = vpack.c.bf16 %v11013_v60, %v11011_v59 }
  0x8b   :  { %v11202_v55 = vpack.c.bf16 %v1396_v7, %v1389_v43  ;;  %v1424_v13 = vand.u32 4294901760, %v1423_v4  ;;  %v11233_v53 = vpack.c.bf16 %v11032_v9, %v11030_v8  ;;  %v11239_v54 = vpack.c.bf16 %v11050_v20, %v11046_v17  ;;  %v638_v9 = vld [vmem:[#allocation9] sm:$0xff]  ;;  %v639_v17 = vld [vmem:[#allocation9 + $0x8] sm:$0xff] }
  0x8c   :  { %v11208_v19 = vpack.c.bf16 %v1410_v56, %v1403_v35  ;;  %v11245_v59 = vpack.c.bf16 %v11074_v33, %v11072_v32  ;;  %v11251_v60 = vpack.c.bf16 %v11093_v44, %v11086_v40  ;;  %v11257_v8 = vpack.c.bf16 %v11113_v57, %v11105_v51  ;;  %v640_v51 = vld [vmem:[#allocation9 + $0x10] sm:$0xff]  ;;  %v641_v57 = vld [vmem:[#allocation9 + $0x18] sm:$0xff] }
  0x8d   :  { %9400 = vmatpush3.bf16.msra.mxu0 %v11077_v34  ;;  %v11263_v20 = vpack.c.bf16 %v11126_v16, %v11124_v15  ;;  %v656_v32 = vand.u32 4294901760, %v638_v9  ;;  %v659_v33 = vand.u32 4294901760, %v639_v17 }
  0x8e   :  { %9401 = vmatprep.subr.bf16.mxu0 %v10844_v0 }
  0x8f   :  { %v11266_v40 = vpack.c.bf16 %v659_v33, %v656_v32  ;;  %v746_v44 = vsub.f32 %v638_v9, %v656_v32  ;;  %v753_v63 = vsub.f32 %v639_v17, %v659_v33 }
  0x91   :  { %9403 = vmatpush3.bf16.msra.mxu0 %v11096_v45  ;;  %9342 = vmatprep.subr.bf16.mxu1 %v11266_v40  ;;  %v747_v2 = vand.u32 4294901760, %v746_v44  ;;  %v754_v24 = vand.u32 4294901760, %v753_v63  ;;  %v11290_v33 = vpack.c.bf16 %v753_v63, %v746_v44 }
  0x92   :  { %9404 = vmatprep.subr.bf16.mxu0 %v10844_v0  ;;  %9344 = vmatpush3.bf16.msra.mxu1 %v11266_v40 }
  0x93   :  { %v748_v16 = vsub.f32 %v746_v44, %v747_v2  ;;  %v755_v42 = vsub.f32 %v753_v63, %v754_v24  ;;  %v11302_v44 = vpack.c.bf16 %v754_v24, %v747_v2 }
  0x95   :  { %9406 = vmatpush3.bf16.msra.mxu0 %v11116_v58  ;;  %v749_v18 = vand.u32 4294901760, %v748_v16  ;;  %v756_v35 = vand.u32 4294901760, %v755_v42 }
  0x96   :  { %9407 = vmatprep.subr.bf16.mxu0 %v10844_v0 }
  0x97   :  { %v11281_v4 = vpack.c.bf16 %v756_v35, %v749_v18 }
  0x99   :  { %9409 = vmatpush3.bf16.msra.mxu0 %v11129_v21 }
  0x9a   :  { %9410 = vmatprep.subr.bf16.mxu0 %v10844_v0 }
  0x9d   :  { %9412 = vmatpush3.bf16.msra.mxu0 %v11140_v28 }
  0x9e   :  { %9413 = vmatprep.subr.bf16.mxu0 %v10844_v0 }
  0xa0   :  { %7646 = vmatmul.mubr.f32.vlgmr.msra.gmra.mrb[2].mxu0 %v1308_v49  ;;  %v1375_v49 = vand.u32 4294901760, %v1374_v31  ;;  %v11212_v31 = vpack.c.bf16 %v1424_v13, %v1417_v39 }
  0xa1   :  { %9415 = vmatpush3.bf16.msra.mxu0 %v11161_v1  ;;  %7680 = vmatprep.mubr.msk.f32.mxu0 %vm10845_vm1, %v10846_v12 }
  0xa2   :  { %9416 = vmatprep.subr.bf16.mxu0 %v10844_v0  ;;  %v11197_v6 = vpack.c.bf16 %v1382_v50, %v1375_v49  ;;  %v662_v49 = vand.u32 4294901760, %v640_v51  ;;  %v665_v50 = vand.u32 4294901760, %v641_v57 }
  0xa4   :  { %v11272_v15 = vpack.c.bf16 %v665_v50, %v662_v49  ;;  %v760_v43 = vsub.f32 %v640_v51, %v662_v49  ;;  %v767_v7 = vsub.f32 %v641_v57, %v665_v50 }
  0xa5   :  { %9418 = vmatpush3.bf16.msra.mxu0 %v11174_v25 }
  0xa6   :  { %9419 = vmatprep.subr.bf16.mxu0 %v10844_v0  ;;  %v761_v56 = vand.u32 4294901760, %v760_v43  ;;  %9346 = vmatprep.subr.bf16.mxu1 %v11272_v15  ;;  %v768_v62 = vand.u32 4294901760, %v767_v7  ;;  %v11294_v51 = vpack.c.bf16 %v767_v7, %v760_v43 }
  0xa7   :  { %9348 = vmatpush3.bf16.msra.mxu1 %v11272_v15 }
  0xa8   :  { %v762_v39 = vsub.f32 %v760_v43, %v761_v56  ;;  %v769_v13 = vsub.f32 %v767_v7, %v768_v62  ;;  %9350 = vmatprep.subr.bf16.mxu1 %v11281_v4  ;;  %v11306_v63 = vpack.c.bf16 %v768_v62, %v761_v56 }
  0xa9   :  { %9421 = vmatpush3.bf16.msra.mxu0 %v11180_v29 }
  0xaa   :  { %9422 = vmatprep.subr.bf16.mxu0 %v10844_v0  ;;  %v763_v9 = vand.u32 4294901760, %v762_v39  ;;  %v770_v17 = vand.u32 4294901760, %v769_v13 }
  0xac   :  { %v11286_v32 = vpack.c.bf16 %v770_v17, %v763_v9 }
  0xad   :  { %9424 = vmatpush3.bf16.msra.mxu0 %v11189_v46 }
  0xae   :  { %9425 = vmatprep.subr.bf16.mxu0 %v10844_v0 }
  0xb1   :  { %9427 = vmatpush3.bf16.msra.mxu0 %v11197_v6 }
  0xb2   :  { %9428 = vmatprep.subr.bf16.mxu0 %v10844_v0 }
  0xb5   :  { %9430 = vmatpush3.bf16.msra.mxu0 %v11202_v55 }
  0xb6   :  { %9431 = vmatprep.subr.bf16.mxu0 %v10844_v0 }
  0xb9   :  { %9433 = vmatpush3.bf16.msra.mxu0 %v11208_v19 }
  0xba   :  { %9434 = vmatprep.subr.bf16.mxu0 %v10844_v0 }
  0xbd   :  { %9436 = vmatpush3.bf16.msra.mxu0 %v11212_v31 }
  0xbe   :  { %9437 = vmatprep.subr.bf16.mxu0 %v10844_v0 }
  0xc0   :  { %7681 = vmatmul.mubr.f32.vlgmr.msra.gmra.mrb[2].mxu0 %v11089_v41 }
  0xc1   :  { %9439 = vmatpush3.bf16.msra.mxu0 %v11218_v36  ;;  %7715 = vmatprep.mubr.msk.f32.mxu0 %vm10845_vm1, %v10846_v12 }
  0xc2   :  { %9440 = vmatprep.subr.bf16.mxu0 %v10844_v0 }
  0xc5   :  { %9442 = vmatpush3.bf16.msra.mxu0 %v11225_v37 }
  0xc6   :  { %9443 = vmatprep.subr.bf16.mxu0 %v10844_v0 }
  0xc9   :  { %9445 = vmatpush3.bf16.msra.mxu0 %v11233_v53 }
  0xca   :  { %9446 = vmatprep.subr.bf16.mxu0 %v10844_v0 }
  0xcd   :  { %9448 = vmatpush3.bf16.msra.mxu0 %v11239_v54 }
  0xce   :  { %9449 = vmatprep.subr.bf16.mxu0 %v10844_v0 }
  0xd1   :  { %9451 = vmatpush3.bf16.msra.mxu0 %v11245_v59 }
  0xd2   :  { %9452 = vmatprep.subr.bf16.mxu0 %v10844_v0 }
  0xd5   :  { %9454 = vmatpush3.bf16.msra.mxu0 %v11251_v60 }
  0xd6   :  { %9455 = vmatprep.subr.bf16.mxu0 %v10844_v0 }
  0xd9   :  { %9457 = vmatpush3.bf16.msra.mxu0 %v11257_v8 }
  0xda   :  { %9458 = vmatprep.subr.bf16.mxu0 %v10844_v0 }
  0xdd   :  { %9460 = vmatpush3.bf16.msra.mxu0 %v11263_v20 }
  0xde   :  { %9461 = vmatprep.subr.bf16.mxu0 %v10844_v0 }
  0xe0   :  { %7716 = vmatmul.mubr.f32.vlgmr.msra.gmra.mrb[2].mxu0 %v11109_v52 }
  0xe1   :  { %9463 = vmatpush3.bf16.msra.mxu0 %v11016_v61  ;;  %7750 = vmatprep.mubr.msk.f32.mxu0 %vm10845_vm1, %v10846_v12 }
  0xe2   :  { %9464 = vmatprep.subr.bf16.mxu0 %v10844_v0 }
  0xe5   :  { %9466 = vmatpush3.bf16.msra.mxu0 %v11035_v10 }
  0xe6   :  { %9467 = vmatprep.subr.bf16.mxu0 %v10844_v0 }
  0xe9   :  { %9469 = vmatpush3.bf16.msra.mxu0 %v11053_v22 }
  0xea   :  { %9470 = vmatprep.subr.bf16.mxu0 %v10844_v0 }
  0xed   :  { %9472 = vmatpush3.bf16.msra.mxu0 %v11077_v34 }
  0xee   :  { %9473 = vmatprep.subr.bf16.mxu0 %v10844_v0 }
  0xf1   :  { %9475 = vmatpush3.bf16.msra.mxu0 %v11096_v45 }
  0xf2   :  { %9476 = vmatprep.subr.bf16.mxu0 %v10844_v0 }
  0xf5   :  { %9478 = vmatpush3.bf16.msra.mxu0 %v11116_v58 }
  0xf6   :  { %9479 = vmatprep.subr.bf16.mxu0 %v10844_v0 }
  0xf9   :  { %9481 = vmatpush3.bf16.msra.mxu0 %v11129_v21 }
  0xfa   :  { %9482 = vmatprep.subr.bf16.mxu0 %v10844_v0 }
  0xfd   :  { %9484 = vmatpush3.bf16.msra.mxu0 %v11140_v28 }
  0xfe   :  { %9485 = vmatprep.subr.bf16.mxu0 %v10844_v0 }
 0x100   :  { %7751 = vmatmul.mubr.f32.vlgmr.msra.gmra.mrb[2].mxu0 %v1306_v11 }
 0x101   :  { %9487 = vmatpush3.bf16.msra.mxu0 %v11025_v5  ;;  %7785 = vmatprep.mubr.msk.f32.mxu0 %vm10845_vm1, %v10846_v12 }
 0x102   :  { %9488 = vmatprep.subr.bf16.mxu0 %v10844_v0 }
 0x105   :  { %9490 = vmatpush3.bf16.msra.mxu0 %v11044_v14 }
 0x106   :  { %9491 = vmatprep.subr.bf16.mxu0 %v10844_v0 }
 0x109   :  { %9493 = vmatpush3.bf16.msra.mxu0 %v11065_v27 }
 0x10a   :  { %9494 = vmatprep.subr.bf16.mxu0 %v10844_v0 }
 0x10d   :  { %9496 = vmatpush3.bf16.msra.mxu0 %v11084_v38 }
 0x10e   :  { %9497 = vmatprep.subr.bf16.mxu0 %v10844_v0 }
 0x111   :  { %9499 = vmatpush3.bf16.msra.mxu0 %v11103_v48 }
 0x112   :  { %9500 = vmatprep.subr.bf16.mxu0 %v10844_v0 }
 0x115   :  { %9502 = vmatpush3.bf16.msra.mxu0 %v11119_v3 }
 0x116   :  { %9503 = vmatprep.subr.bf16.mxu0 %v10844_v0 }
 0x119   :  { %9505 = vmatpush3.bf16.msra.mxu0 %v11138_v26 }
 0x11a   :  { %9506 = vmatprep.subr.bf16.mxu0 %v10844_v0 }
 0x11d   :  { %9508 = vmatpush3.bf16.msra.mxu0 %v11155_v47 }
 0x11e   :  { %9509 = vmatprep.subr.bf16.mxu0 %v10844_v0 }
 0x120   :  { %7786 = vmatmul.mubr.f32.vlgmr.msra.gmra.mrb[2].mxu0 %v11089_v41 }
 0x121   :  { %9511 = vmatpush3.bf16.msra.mxu0 %v11016_v61  ;;  %7820 = vmatprep.mubr.msk.f32.mxu0 %vm10845_vm1, %v10846_v12 }
 0x122   :  { %9512 = vmatprep.subr.bf16.mxu0 %v10844_v0 }
 0x125   :  { %9514 = vmatpush3.bf16.msra.mxu0 %v11035_v10 }
 0x126   :  { %9515 = vmatprep.subr.bf16.mxu0 %v10844_v0 }
 0x129   :  { %9517 = vmatpush3.bf16.msra.mxu0 %v11053_v22 }
 0x12a   :  { %9518 = vmatprep.subr.bf16.mxu0 %v10844_v0 }
 0x12d   :  { %9520 = vmatpush3.bf16.msra.mxu0 %v11077_v34 }
 0x12e   :  { %9521 = vmatprep.subr.bf16.mxu0 %v10844_v0 }
 0x131   :  { %9523 = vmatpush3.bf16.msra.mxu0 %v11096_v45 }
 0x132   :  { %9524 = vmatprep.subr.bf16.mxu0 %v10844_v0 }
 0x135   :  { %9526 = vmatpush3.bf16.msra.mxu0 %v11116_v58 }
 0x136   :  { %9527 = vmatprep.subr.bf16.mxu0 %v10844_v0 }
 0x139   :  { %9529 = vmatpush3.bf16.msra.mxu0 %v11129_v21 }
 0x13a   :  { %9530 = vmatprep.subr.bf16.mxu0 %v10844_v0 }
 0x13d   :  { %9532 = vmatpush3.bf16.msra.mxu0 %v11140_v28 }
 0x13e   :  { %9677 = vmatprep.subr.bf16.mxu0 %v10844_v0 }
 0x140   :  { %7821 = vmatmul.mubr.f32.vlgmr.msra.gmra.mrb[2].mxu0 %v11089_v41  ;;  %v6589_v41 = vld [vmem:[%s12326_s6] ss:$0 sm:$0xff] }
 0x141   :  { %9679 = vmatpush3.bf16.msra.mxu0 %v11016_v61  ;;  %8065 = vmatprep.mubr.msk.f32.mxu0 %vm10845_vm1, %v10846_v12 }
 0x142   :  { %9680 = vmatprep.subr.bf16.mxu0 %v10844_v0 }
 0x145   :  { %9682 = vmatpush3.bf16.msra.mxu0 %v11035_v10 }
 0x146   :  { %9683 = vmatprep.subr.bf16.mxu0 %v10844_v0 }
 0x149   :  { %9685 = vmatpush3.bf16.msra.mxu0 %v11053_v22 }
 0x14a   :  { %9686 = vmatprep.subr.bf16.mxu0 %v10844_v0 }
 0x14d   :  { %9688 = vmatpush3.bf16.msra.mxu0 %v11077_v34 }
 0x14e   :  { %9689 = vmatprep.subr.bf16.mxu0 %v10844_v0 }
 0x151   :  { %9691 = vmatpush3.bf16.msra.mxu0 %v11096_v45 }
 0x152   :  { %9692 = vmatprep.subr.bf16.mxu0 %v10844_v0 }
 0x153   :  { %v7546_v52 = vpop.f32.mrb[0].mxu0 }
 0x154   :  { %v10541_v11 = vadd.f32 %v7546_v52, %v6589_v41  ;;  %v626_v57 = vpop.f32.mrb[1].mxu0 }
 0x155   :  { %v10542_v49 = vadd.f32 %v6589_v41, %v626_v57  ;;  %9694 = vmatpush3.bf16.msra.mxu0 %v11116_v58  ;;  %v6590_v41 = vld [vmem:[%s12328_s8] ss:$0 sm:$0xff] }
 0x156   :  { %v637_v50 = vmax.f32 %v10541_v11, 0.0  ;;  %9695 = vmatprep.subr.bf16.mxu0 %v10844_v0 }
 0x157   :  { %v636_v2 = vmax.f32 %v10542_v49, 0.0 }
 0x158   :  { %v653_v24 = vsel %vm101_vm0, %v637_v50, 0 }
 0x159   :  { %v734_v16 = vand.u32 4294901760, %v653_v24  ;;  %v650_v42 = vsel %vm101_vm0, %v636_v2, 0  ;;  %9697 = vmatpush3.bf16.msra.mxu0 %v11129_v21 }
 0x15a   :  { %v724_v43 = vand.u32 4294901760, %v650_v42  ;;  %9698 = vmatprep.subr.bf16.mxu0 %v10844_v0 }
 0x15b   :  { %v735_v7 = vsub.f32 %v653_v24, %v734_v16 }
 0x15c   :  { %v725_v18 = vsub.f32 %v650_v42, %v724_v43 }
 0x15d   :  { %v736_v35 = vand.u32 4294901760, %v735_v7  ;;  %9700 = vmatpush3.bf16.msra.mxu0 %v11140_v28 }
 0x15e   :  { %v726_v56 = vand.u32 4294901760, %v725_v18  ;;  %9701 = vmatprep.subr.bf16.mxu0 %v10844_v0 }
 0x15f   :  { %v737_v62 = vsub.f32 %v735_v7, %v736_v35 }
 0x160   :  { %v727_v39 = vsub.f32 %v725_v18, %v726_v56 }
 0x161   :  { %v738_v9 = vand.u32 4294901760, %v737_v62 }
 0x162   :  { %v728_v13 = vand.u32 4294901760, %v727_v39 }
 0x164   :  { %7555 = vmatprep.mubr.f32.mxu1 %v728_v13 }
 0x165   :  { %7556 = vmatmul.mubr.f32.vlgmr.msra.gmra.mrb[0].mxu1 %v738_v9  ;;  %v1205_v9 = vlaneseq }
 0x166   :  { %9352 = vmatpush3.bf16.msra.mxu1 %v11281_v4  ;;  %7566 = vmatprep.mubr.f32.mxu1 %v724_v43 }
 0x167   :  { %9354 = vmatprep.subr.bf16.mxu1 %v11286_v32 }
 0x16a   :  { %9356 = vmatpush3.bf16.msra.mxu1 %v11286_v32 }
 0x16b   :  { %9358 = vmatprep.subr.bf16.mxu1 %v11290_v33 }
 0x16d   :  { %7567 = vmatmul.mubr.f32.vlgmr.msra.gmra.mrb[0].mxu1 %v734_v16 }
 0x16e   :  { %9360 = vmatpush3.bf16.msra.mxu1 %v11290_v33  ;;  %7577 = vmatprep.mubr.f32.mxu1 %v725_v18 }
 0x16f   :  { %9362 = vmatprep.subr.bf16.mxu1 %v11294_v51 }
 0x172   :  { %9364 = vmatpush3.bf16.msra.mxu1 %v11294_v51 }
 0x173   :  { %9366 = vmatprep.subr.bf16.mxu1 %v11266_v40 }
 0x175   :  { %7578 = vmatmul.mubr.f32.vlgmr.msra.gmra.mrb[0].mxu1 %v735_v7 }
 0x176   :  { %9368 = vmatpush3.bf16.msra.mxu1 %v11266_v40  ;;  %7588 = vmatprep.mubr.f32.mxu1 %v726_v56 }
 0x177   :  { %9370 = vmatprep.subr.bf16.mxu1 %v11272_v15 }
 0x17a   :  { %9372 = vmatpush3.bf16.msra.mxu1 %v11272_v15 }
 0x17b   :  { %9374 = vmatprep.subr.bf16.mxu1 %v11302_v44 }
 0x17d   :  { %7589 = vmatmul.mubr.f32.vlgmr.msra.gmra.mrb[0].mxu1 %v736_v35 }
 0x17e   :  { %9376 = vmatpush3.bf16.msra.mxu1 %v11302_v44  ;;  %7599 = vmatprep.mubr.f32.mxu1 %v724_v43 }
 0x17f   :  { %9378 = vmatprep.subr.bf16.mxu1 %v11306_v63 }
 0x182   :  { %9380 = vmatpush3.bf16.msra.mxu1 %v11306_v63 }
 0x183   :  { %9382 = vmatprep.subr.bf16.mxu1 %v11266_v40 }
 0x185   :  { %7600 = vmatmul.mubr.f32.vlgmr.msra.gmra.mrb[0].mxu1 %v734_v16 }
 0x186   :  { %9384 = vmatpush3.bf16.msra.mxu1 %v11266_v40  ;;  %7610 = vmatprep.mubr.f32.mxu1 %v724_v43  ;;  %v11412_v40 = vld [vmem:[%s12323_s3] ss:$0 sm:$0xff] }
 0x187   :  { %9386 = vmatprep.subr.bf16.mxu1 %v11272_v15 }
 0x18a   :  { %9388 = vmatpush3.bf16.msra.mxu1 %v11272_v15 }
 0x18b   :  { %9533 = vmatprep.subr.bf16.mxu1 %v10844_v0 }
 0x18d   :  { %7611 = vmatmul.mubr.f32.vlgmr.msra.gmra.mrb[0].mxu1 %v734_v16 }
 0x18e   :  { %9535 = vmatpush3.bf16.msra.mxu1 %v11016_v61  ;;  %7855 = vmatprep.mubr.msk.f32.mxu1 %vm10845_vm1, %v10846_v12 }
 0x18f   :  { %9536 = vmatprep.subr.bf16.mxu1 %v10844_v0 }
 0x192   :  { %9538 = vmatpush3.bf16.msra.mxu1 %v11035_v10 }
 0x193   :  { %9539 = vmatprep.subr.bf16.mxu1 %v10844_v0 }
 0x196   :  { %9541 = vmatpush3.bf16.msra.mxu1 %v11053_v22 }
 0x197   :  { %9542 = vmatprep.subr.bf16.mxu1 %v10844_v0 }
 0x19a   :  { %9544 = vmatpush3.bf16.msra.mxu1 %v11077_v34 }
 0x19b   :  { %9545 = vmatprep.subr.bf16.mxu1 %v10844_v0 }
 0x19e   :  { %9547 = vmatpush3.bf16.msra.mxu1 %v11096_v45 }
 0x19f   :  { %9548 = vmatprep.subr.bf16.mxu1 %v10844_v0 }
 0x1a2   :  { %9550 = vmatpush3.bf16.msra.mxu1 %v11116_v58 }
 0x1a3   :  { %9551 = vmatprep.subr.bf16.mxu1 %v10844_v0 }
 0x1a6   :  { %9553 = vmatpush3.bf16.msra.mxu1 %v11129_v21 }
 0x1a7   :  { %9554 = vmatprep.subr.bf16.mxu1 %v10844_v0 }
 0x1aa   :  { %9556 = vmatpush3.bf16.msra.mxu1 %v11140_v28 }
 0x1ab   :  { %9557 = vmatprep.subr.bf16.mxu1 %v10844_v0 }
 0x213   :  { %v1860_v15 = vpop.f32.mrb[2].mxu0 }
 0x214   :  { %v10545_v4 = vadd.f32 %v11412_v40, %v1860_v15  ;;  %v7822_v17 = vpop.f32.mrb[3].mxu0  ;;  %v11425_v15 = vand.u32 127, %v1205_v9 }
 0x216   :  { %v1864_v32 = vand.u32 2147483647, %v10545_v4  ;;  %vm1207_vm2 = vcmp.ge.s32.totalorder %v11425_v15, 96 }
 0x218   :  { %v1865_v33 = vmul.f32 0.5, %v1864_v32 }
 0x21a   :  { %v1866_v51 = vmul.f32 1.442695, %v1865_v33 }
 0x21c   :  { %10669 = vpow2.f32 %v1866_v51 }
 0x226   :  { %v10670_v44 = vpop.eup %10669 }
 0x227   :  { %1868 = vrot.lane.b32.xlu0 %v10670_v44, %s10847_s19  ;;  %v1874_v63 = vmul.f32 %v10670_v44, %v11069_v30 }
 0x22b   :  { %1875 = vrot.lane.b32.xlu0 %v1874_v63, %s10847_s19 }
 0x22f   :  { %1887 = vrot.lane.b32.xlu0 %v11069_v30, %s10848_s20 }
 0x260   :  { %v7612_v52 = vpop.f32.mrb[0].mxu1 }
 0x261   :  { %v10543_v11 = vadd.f32 %v7612_v52, %v6590_v41  ;;  %v1173_v57 = vpop.f32.mrb[1].mxu1 }
 0x262   :  { %v10544_v49 = vadd.f32 %v6590_v41, %v1173_v57 }
 0x263   :  { %v1184_v50 = vmul.f32 0.125, %v10543_v11 }
 0x264   :  { %v1183_v2 = vmul.f32 0.125, %v10544_v49 }
 0x265   :  { %1186 = vst [vmem:[#allocation2 + $0x8] sm:$0xff] %v1184_v50 }
 0x266   :  { %1185 = vst [vmem:[#allocation2] sm:$0xff] %v1183_v2 }
 0x26d   :  { %v1883_v39 = vld [vmem:[#allocation2] sm:$0x3]  ;;  %v2551_v9 = vld [vmem:[#allocation2 + $0x2] sm:$0x3] }
 0x299   :  { %v1869_v24 = vpop.permute.xlu0 %1868 }
 0x29a   :  { %v1870_v16 = vadd.f32 %v10670_v44, %v1869_v24 }
 0x29c   :  { %1871 = vrot.lane.b32.xlu1 %v1870_v16, %s10849_s25 }
 0x29d   :  { %v1876_v42 = vpop.permute.xlu0 %1875 }
 0x29e   :  { %v1877_v43 = vadd.f32 %v1876_v42, %v1874_v63 }
 0x2a0   :  { %1878 = vrot.lane.b32.xlu1 %v1877_v43, %s10849_s25 }
 0x2a1   :  { %v1888_v4 = vpop.permute.xlu0 %1887 }
 0x30e   :  { %v1872_v30 = vpop.permute.xlu1 %1871 }
 0x30f   :  { %v1873_v7 = vadd.f32 %v1872_v30, %v1870_v16 }
 0x311   :  { %10671 = vrcp.f32 %v1873_v7 }
 0x312   :  { %v1879_v18 = vpop.permute.xlu1 %1878 }
 0x313   :  { %v1880_v35 = vadd.f32 %v1879_v18, %v1877_v43 }
 0x31b   :  { %v10672_v56 = vpop.eup %10671 }
 0x31c   :  { %v1882_v62 = vmul.f32 %v10672_v56, %v1880_v35 }
 0x31e   :  { %v1884_v13 = vadd.f32 %v1883_v39, %v1882_v62 }
 0x320   :  { %10673 = vtanh.f32 %v1884_v13 }
 0x32a   :  { %v10674_v17 = vpop.eup %10673 }
 0x32b   :  { %1886 = vst [vmem:[#allocation11] sm:$0x3] %v10674_v17  ;;  %v1889_v32 = vsel %vm1207_vm2, %v10674_v17, %v1888_v4 }
 0x32c   :  { %v11431_v33 = vmul.f32 %v11058_v23, %v1889_v32 }
 0x32e   :  { %v11434_v51 = vand.u32 4294901760, %v11431_v33 }
 0x330   :  { %v1973_v44 = vsub.f32 %v11431_v33, %v11434_v51 }
 0x332   :  { %v1974_v63 = vand.u32 4294901760, %v1973_v44 }
 0x334   :  { %v1975_v41 = vsub.f32 %v1973_v44, %v1974_v63 }
 0x336   :  { %v1976_v52 = vand.u32 4294901760, %v1975_v41 }
 0x338   :  { %7856 = vmatmul.mubr.f32.vlgmr.msra.gmra.mrb[2].mxu1 %v1976_v52 }
 0x339   :  { %9559 = vmatpush3.bf16.msra.mxu1 %v11161_v1  ;;  %7890 = vmatprep.mubr.msk.f32.mxu1 %vm10845_vm1, %v10846_v12 }
 0x33a   :  { %9560 = vmatprep.subr.bf16.mxu1 %v10844_v0 }
 0x33d   :  { %9562 = vmatpush3.bf16.msra.mxu1 %v11174_v25 }
 0x33e   :  { %9563 = vmatprep.subr.bf16.mxu1 %v10844_v0 }
 0x341   :  { %9565 = vmatpush3.bf16.msra.mxu1 %v11180_v29 }
 0x342   :  { %9566 = vmatprep.subr.bf16.mxu1 %v10844_v0 }
 0x345   :  { %9568 = vmatpush3.bf16.msra.mxu1 %v11189_v46 }
 0x346   :  { %9569 = vmatprep.subr.bf16.mxu1 %v10844_v0 }
 0x349   :  { %9571 = vmatpush3.bf16.msra.mxu1 %v11197_v6 }
 0x34a   :  { %9572 = vmatprep.subr.bf16.mxu1 %v10844_v0 }
 0x34d   :  { %9574 = vmatpush3.bf16.msra.mxu1 %v11202_v55 }
 0x34e   :  { %9575 = vmatprep.subr.bf16.mxu1 %v10844_v0 }
 0x351   :  { %9577 = vmatpush3.bf16.msra.mxu1 %v11208_v19 }
 0x352   :  { %9578 = vmatprep.subr.bf16.mxu1 %v10844_v0 }
 0x355   :  { %9580 = vmatpush3.bf16.msra.mxu1 %v11212_v31 }
 0x356   :  { %9581 = vmatprep.subr.bf16.mxu1 %v10844_v0 }
 0x358   :  { %7891 = vmatmul.mubr.f32.vlgmr.msra.gmra.mrb[2].mxu1 %v11434_v51 }
 0x359   :  { %9583 = vmatpush3.bf16.msra.mxu1 %v11218_v36  ;;  %7925 = vmatprep.mubr.msk.f32.mxu1 %vm10845_vm1, %v10846_v12 }
 0x35a   :  { %9584 = vmatprep.subr.bf16.mxu1 %v10844_v0 }
 0x35d   :  { %9586 = vmatpush3.bf16.msra.mxu1 %v11225_v37 }
 0x35e   :  { %9587 = vmatprep.subr.bf16.mxu1 %v10844_v0 }
 0x361   :  { %9589 = vmatpush3.bf16.msra.mxu1 %v11233_v53 }
 0x362   :  { %9590 = vmatprep.subr.bf16.mxu1 %v10844_v0 }
 0x365   :  { %9592 = vmatpush3.bf16.msra.mxu1 %v11239_v54 }
 0x366   :  { %9593 = vmatprep.subr.bf16.mxu1 %v10844_v0 }
 0x369   :  { %9595 = vmatpush3.bf16.msra.mxu1 %v11245_v59 }
 0x36a   :  { %9596 = vmatprep.subr.bf16.mxu1 %v10844_v0 }
 0x36d   :  { %9598 = vmatpush3.bf16.msra.mxu1 %v11251_v60 }
 0x36e   :  { %9599 = vmatprep.subr.bf16.mxu1 %v10844_v0 }
 0x371   :  { %9601 = vmatpush3.bf16.msra.mxu1 %v11257_v8 }
 0x372   :  { %9602 = vmatprep.subr.bf16.mxu1 %v10844_v0 }
 0x375   :  { %9604 = vmatpush3.bf16.msra.mxu1 %v11263_v20 }
 0x376   :  { %9605 = vmatprep.subr.bf16.mxu1 %v10844_v0 }
 0x378   :  { %7926 = vmatmul.mubr.f32.vlgmr.msra.gmra.mrb[2].mxu1 %v1973_v44 }
 0x379   :  { %9607 = vmatpush3.bf16.msra.mxu1 %v11016_v61  ;;  %7960 = vmatprep.mubr.msk.f32.mxu1 %vm10845_vm1, %v10846_v12 }
 0x37a   :  { %9608 = vmatprep.subr.bf16.mxu1 %v10844_v0 }
 0x37d   :  { %9610 = vmatpush3.bf16.msra.mxu1 %v11035_v10 }
 0x37e   :  { %9611 = vmatprep.subr.bf16.mxu1 %v10844_v0 }
 0x381   :  { %9613 = vmatpush3.bf16.msra.mxu1 %v11053_v22 }
 0x382   :  { %9614 = vmatprep.subr.bf16.mxu1 %v10844_v0 }
 0x385   :  { %9616 = vmatpush3.bf16.msra.mxu1 %v11077_v34 }
 0x386   :  { %9617 = vmatprep.subr.bf16.mxu1 %v10844_v0 }
 0x389   :  { %9619 = vmatpush3.bf16.msra.mxu1 %v11096_v45 }
 0x38a   :  { %9620 = vmatprep.subr.bf16.mxu1 %v10844_v0 }
 0x38d   :  { %9622 = vmatpush3.bf16.msra.mxu1 %v11116_v58 }
 0x38e   :  { %9623 = vmatprep.subr.bf16.mxu1 %v10844_v0 }
 0x391   :  { %9625 = vmatpush3.bf16.msra.mxu1 %v11129_v21 }
 0x392   :  { %9626 = vmatprep.subr.bf16.mxu1 %v10844_v0 }
 0x395   :  { %9628 = vmatpush3.bf16.msra.mxu1 %v11140_v28 }
 0x396   :  { %9629 = vmatprep.subr.bf16.mxu1 %v10844_v0 }
 0x398   :  { %7961 = vmatmul.mubr.f32.vlgmr.msra.gmra.mrb[2].mxu1 %v1974_v63 }
 0x399   :  { %9631 = vmatpush3.bf16.msra.mxu1 %v11025_v5  ;;  %7995 = vmatprep.mubr.msk.f32.mxu1 %vm10845_vm1, %v10846_v12 }
 0x39a   :  { %9632 = vmatprep.subr.bf16.mxu1 %v10844_v0 }
 0x39d   :  { %9634 = vmatpush3.bf16.msra.mxu1 %v11044_v14 }
 0x39e   :  { %9635 = vmatprep.subr.bf16.mxu1 %v10844_v0 }
 0x3a1   :  { %9637 = vmatpush3.bf16.msra.mxu1 %v11065_v27 }
 0x3a2   :  { %9638 = vmatprep.subr.bf16.mxu1 %v10844_v0 }
 0x3a5   :  { %9640 = vmatpush3.bf16.msra.mxu1 %v11084_v38 }
 0x3a6   :  { %9641 = vmatprep.subr.bf16.mxu1 %v10844_v0 }
 0x3a9   :  { %9643 = vmatpush3.bf16.msra.mxu1 %v11103_v48 }
 0x3aa   :  { %9644 = vmatprep.subr.bf16.mxu1 %v10844_v0 }
 0x3ad   :  { %9646 = vmatpush3.bf16.msra.mxu1 %v11119_v3 }
 0x3ae   :  { %9647 = vmatprep.subr.bf16.mxu1 %v10844_v0 }
 0x3b1   :  { %9649 = vmatpush3.bf16.msra.mxu1 %v11138_v26 }
 0x3b2   :  { %9650 = vmatprep.subr.bf16.mxu1 %v10844_v0 }
 0x3b5   :  { %9652 = vmatpush3.bf16.msra.mxu1 %v11155_v47 }
 0x3b6   :  { %9653 = vmatprep.subr.bf16.mxu1 %v10844_v0 }
 0x3b8   :  { %7996 = vmatmul.mubr.f32.vlgmr.msra.gmra.mrb[2].mxu1 %v11434_v51 }
 0x3b9   :  { %9655 = vmatpush3.bf16.msra.mxu1 %v11016_v61  ;;  %8030 = vmatprep.mubr.msk.f32.mxu1 %vm10845_vm1, %v10846_v12 }
 0x3ba   :  { %9656 = vmatprep.subr.bf16.mxu1 %v10844_v0 }
 0x3bd   :  { %9658 = vmatpush3.bf16.msra.mxu1 %v11035_v10 }
 0x3be   :  { %9659 = vmatprep.subr.bf16.mxu1 %v10844_v0 }
 0x3c1   :  { %9661 = vmatpush3.bf16.msra.mxu1 %v11053_v22 }
 0x3c2   :  { %9662 = vmatprep.subr.bf16.mxu1 %v10844_v0 }
 0x3c5   :  { %9664 = vmatpush3.bf16.msra.mxu1 %v11077_v34 }
 0x3c6   :  { %9665 = vmatprep.subr.bf16.mxu1 %v10844_v0 }
 0x3c9   :  { %9667 = vmatpush3.bf16.msra.mxu1 %v11096_v45 }
 0x3ca   :  { %9668 = vmatprep.subr.bf16.mxu1 %v10844_v0 }
 0x3cd   :  { %9670 = vmatpush3.bf16.msra.mxu1 %v11116_v58 }
 0x3ce   :  { %9671 = vmatprep.subr.bf16.mxu1 %v10844_v0 }
 0x3d1   :  { %9673 = vmatpush3.bf16.msra.mxu1 %v11129_v21 }
 0x3d2   :  { %9674 = vmatprep.subr.bf16.mxu1 %v10844_v0 }
 0x3d5   :  { %9676 = vmatpush3.bf16.msra.mxu1 %v11140_v28 }
 0x3d6   :  { %9821 = vmatprep.subr.bf16.mxu1 %v10844_v0 }
 0x3d8   :  { %8031 = vmatmul.mubr.f32.vlgmr.msra.gmra.mrb[2].mxu1 %v11434_v51 }
 0x3d9   :  { %9823 = vmatpush3.bf16.msra.mxu1 %v11016_v61  ;;  %8275 = vmatprep.mubr.msk.f32.mxu1 %vm10845_vm1, %v10846_v12 }
 0x3da   :  { %9824 = vmatprep.subr.bf16.mxu1 %v10844_v0 }
 0x3dd   :  { %9826 = vmatpush3.bf16.msra.mxu1 %v11035_v10 }
 0x3de   :  { %9827 = vmatprep.subr.bf16.mxu1 %v10844_v0 }
 0x3e1   :  { %9829 = vmatpush3.bf16.msra.mxu1 %v11053_v22 }
 0x3e2   :  { %9830 = vmatprep.subr.bf16.mxu1 %v10844_v0 }
 0x3e5   :  { %9832 = vmatpush3.bf16.msra.mxu1 %v11077_v34 }
 0x3e6   :  { %9833 = vmatprep.subr.bf16.mxu1 %v10844_v0 }
 0x3e9   :  { %9835 = vmatpush3.bf16.msra.mxu1 %v11096_v45 }
 0x3ea   :  { %9836 = vmatprep.subr.bf16.mxu1 %v10844_v0 }
 0x3ed   :  { %9838 = vmatpush3.bf16.msra.mxu1 %v11116_v58 }
 0x3ee   :  { %9839 = vmatprep.subr.bf16.mxu1 %v10844_v0 }
 0x3f1   :  { %9841 = vmatpush3.bf16.msra.mxu1 %v11129_v21 }
 0x3f2   :  { %9842 = vmatprep.subr.bf16.mxu1 %v10844_v0 }
 0x3f5   :  { %9844 = vmatpush3.bf16.msra.mxu1 %v11140_v28 }
 0x3f6   :  { %9845 = vmatprep.subr.bf16.mxu1 %v10844_v0 }
 0x4ab   :  { %v2528_v23 = vpop.f32.mrb[2].mxu1 }
 0x4ac   :  { %v10546_v11 = vadd.f32 %v11412_v40, %v2528_v23  ;;  %v8032_v57 = vpop.f32.mrb[3].mxu1 }
 0x4ae   :  { %v2532_v49 = vand.u32 2147483647, %v10546_v11 }
 0x4b0   :  { %v2533_v50 = vmul.f32 0.5, %v2532_v49 }
 0x4b2   :  { %v2534_v2 = vmul.f32 1.442695, %v2533_v50 }
 0x4b4   :  { %10675 = vpow2.f32 %v2534_v2 }
 0x4be   :  { %v10676_v24 = vpop.eup %10675 }
 0x4bf   :  { %2536 = vrot.lane.b32.xlu1 %v10676_v24, %s10847_s19  ;;  %v2542_v16 = vmul.f32 %v10676_v24, %v11431_v33 }
 0x4c1   :  { %2543 = vrot.lane.b32.xlu0 %v2542_v16, %s10847_s19 }
 0x531   :  { %v2537_v42 = vpop.permute.xlu1 %2536 }
 0x532   :  { %v2538_v43 = vadd.f32 %v10676_v24, %v2537_v42 }
 0x533   :  { %v2544_v30 = vpop.permute.xlu0 %2543 }
 0x534   :  { %v2545_v7 = vadd.f32 %v2544_v30, %v2542_v16  ;;  %2539 = vrot.lane.b32.xlu1 %v2538_v43, %s10849_s25 }
 0x536   :  { %2546 = vrot.lane.b32.xlu0 %v2545_v7, %s10849_s25 }
 0x538   :  { %2556 = vrot.lane.b32.xlu1 %v11431_v33, %s10848_s20  ;;  %v11562_v33 = vld [vmem:[%s12324_s4] ss:$0 sm:$0xff] }
 0x5a6   :  { %v2540_v18 = vpop.permute.xlu1 %2539 }
 0x5a7   :  { %v2541_v35 = vadd.f32 %v2540_v18, %v2538_v43 }
 0x5a8   :  { %v2547_v56 = vpop.permute.xlu0 %2546 }
 0x5a9   :  { %10677 = vrcp.f32 %v2541_v35  ;;  %v2548_v62 = vadd.f32 %v2547_v56, %v2545_v7 }
 0x5aa   :  { %v2557_v32 = vpop.permute.xlu1 %2556 }
 0x5b3   :  { %v10678_v39 = vpop.eup %10677 }
 0x5b4   :  { %v2550_v13 = vmul.f32 %v10678_v39, %v2548_v62 }
 0x5b6   :  { %v2552_v4 = vadd.f32 %v2551_v9, %v2550_v13 }
 0x5b8   :  { %10679 = vtanh.f32 %v2552_v4 }
 0x5c2   :  { %v10680_v17 = vpop.eup %10679 }
 0x5c3   :  { %2555 = vst [vmem:[#allocation11 + $0x2] sm:$0x3] %v10680_v17  ;;  %v2558_v51 = vsel %vm1207_vm2, %v10680_v17, %v2557_v32  ;;  %v3220_v17 = vld [vmem:[#allocation2 + $0x4] sm:$0x3] }
 0x5c4   :  { %v11565_v44 = vmul.f32 %v11562_v33, %v2558_v51 }
 0x5c6   :  { %v11568_v63 = vand.u32 4294901760, %v11565_v44 }
 0x5c8   :  { %v2642_v41 = vsub.f32 %v11565_v44, %v11568_v63 }
 0x5ca   :  { %v2643_v52 = vand.u32 4294901760, %v2642_v41 }
 0x5cc   :  { %v2644_v23 = vsub.f32 %v2642_v41, %v2643_v52 }
 0x5ce   :  { %v2645_v11 = vand.u32 4294901760, %v2644_v23 }
 0x5d0   :  { %8066 = vmatmul.mubr.f32.vlgmr.msra.gmra.mrb[4].mxu0 %v2645_v11 }
 0x5d1   :  { %9703 = vmatpush3.bf16.msra.mxu0 %v11161_v1  ;;  %8100 = vmatprep.mubr.msk.f32.mxu0 %vm10845_vm1, %v10846_v12 }
 0x5d2   :  { %9704 = vmatprep.subr.bf16.mxu0 %v10844_v0 }
 0x5d5   :  { %9706 = vmatpush3.bf16.msra.mxu0 %v11174_v25 }
 0x5d6   :  { %9707 = vmatprep.subr.bf16.mxu0 %v10844_v0 }
 0x5d9   :  { %9709 = vmatpush3.bf16.msra.mxu0 %v11180_v29 }
 0x5da   :  { %9710 = vmatprep.subr.bf16.mxu0 %v10844_v0 }
 0x5dd   :  { %9712 = vmatpush3.bf16.msra.mxu0 %v11189_v46 }
 0x5de   :  { %9713 = vmatprep.subr.bf16.mxu0 %v10844_v0 }
 0x5e1   :  { %9715 = vmatpush3.bf16.msra.mxu0 %v11197_v6 }
 0x5e2   :  { %9716 = vmatprep.subr.bf16.mxu0 %v10844_v0 }
 0x5e5   :  { %9718 = vmatpush3.bf16.msra.mxu0 %v11202_v55 }
 0x5e6   :  { %9719 = vmatprep.subr.bf16.mxu0 %v10844_v0 }
 0x5e9   :  { %9721 = vmatpush3.bf16.msra.mxu0 %v11208_v19 }
 0x5ea   :  { %9722 = vmatprep.subr.bf16.mxu0 %v10844_v0 }
 0x5ed   :  { %9724 = vmatpush3.bf16.msra.mxu0 %v11212_v31 }
 0x5ee   :  { %9725 = vmatprep.subr.bf16.mxu0 %v10844_v0 }
 0x5f0   :  { %8101 = vmatmul.mubr.f32.vlgmr.msra.gmra.mrb[4].mxu0 %v11568_v63 }
 0x5f1   :  { %9727 = vmatpush3.bf16.msra.mxu0 %v11218_v36  ;;  %8135 = vmatprep.mubr.msk.f32.mxu0 %vm10845_vm1, %v10846_v12 }
 0x5f2   :  { %9728 = vmatprep.subr.bf16.mxu0 %v10844_v0 }
 0x5f5   :  { %9730 = vmatpush3.bf16.msra.mxu0 %v11225_v37 }
 0x5f6   :  { %9731 = vmatprep.subr.bf16.mxu0 %v10844_v0 }
 0x5f9   :  { %9733 = vmatpush3.bf16.msra.mxu0 %v11233_v53 }
 0x5fa   :  { %9734 = vmatprep.subr.bf16.mxu0 %v10844_v0 }
 0x5fd   :  { %9736 = vmatpush3.bf16.msra.mxu0 %v11239_v54 }
 0x5fe   :  { %9737 = vmatprep.subr.bf16.mxu0 %v10844_v0 }
 0x601   :  { %9739 = vmatpush3.bf16.msra.mxu0 %v11245_v59 }
 0x602   :  { %9740 = vmatprep.subr.bf16.mxu0 %v10844_v0 }
 0x605   :  { %9742 = vmatpush3.bf16.msra.mxu0 %v11251_v60 }
 0x606   :  { %9743 = vmatprep.subr.bf16.mxu0 %v10844_v0 }
 0x609   :  { %9745 = vmatpush3.bf16.msra.mxu0 %v11257_v8 }
 0x60a   :  { %9746 = vmatprep.subr.bf16.mxu0 %v10844_v0 }
 0x60d   :  { %9748 = vmatpush3.bf16.msra.mxu0 %v11263_v20 }
 0x60e   :  { %9749 = vmatprep.subr.bf16.mxu0 %v10844_v0 }
 0x610   :  { %8136 = vmatmul.mubr.f32.vlgmr.msra.gmra.mrb[4].mxu0 %v2642_v41 }
 0x611   :  { %9751 = vmatpush3.bf16.msra.mxu0 %v11016_v61  ;;  %8170 = vmatprep.mubr.msk.f32.mxu0 %vm10845_vm1, %v10846_v12 }
 0x612   :  { %9752 = vmatprep.subr.bf16.mxu0 %v10844_v0 }
 0x615   :  { %9754 = vmatpush3.bf16.msra.mxu0 %v11035_v10 }
 0x616   :  { %9755 = vmatprep.subr.bf16.mxu0 %v10844_v0 }
 0x619   :  { %9757 = vmatpush3.bf16.msra.mxu0 %v11053_v22 }
 0x61a   :  { %9758 = vmatprep.subr.bf16.mxu0 %v10844_v0 }
 0x61d   :  { %9760 = vmatpush3.bf16.msra.mxu0 %v11077_v34 }
 0x61e   :  { %9761 = vmatprep.subr.bf16.mxu0 %v10844_v0 }
 0x621   :  { %9763 = vmatpush3.bf16.msra.mxu0 %v11096_v45 }
 0x622   :  { %9764 = vmatprep.subr.bf16.mxu0 %v10844_v0 }
 0x625   :  { %9766 = vmatpush3.bf16.msra.mxu0 %v11116_v58 }
 0x626   :  { %9767 = vmatprep.subr.bf16.mxu0 %v10844_v0 }
 0x629   :  { %9769 = vmatpush3.bf16.msra.mxu0 %v11129_v21 }
 0x62a   :  { %9770 = vmatprep.subr.bf16.mxu0 %v10844_v0 }
 0x62d   :  { %9772 = vmatpush3.bf16.msra.mxu0 %v11140_v28 }
 0x62e   :  { %9773 = vmatprep.subr.bf16.mxu0 %v10844_v0 }
 0x630   :  { %8171 = vmatmul.mubr.f32.vlgmr.msra.gmra.mrb[4].mxu0 %v2643_v52 }
 0x631   :  { %9775 = vmatpush3.bf16.msra.mxu0 %v11025_v5  ;;  %8205 = vmatprep.mubr.msk.f32.mxu0 %vm10845_vm1, %v10846_v12 }
 0x632   :  { %9776 = vmatprep.subr.bf16.mxu0 %v10844_v0 }
 0x635   :  { %9778 = vmatpush3.bf16.msra.mxu0 %v11044_v14 }
 0x636   :  { %9779 = vmatprep.subr.bf16.mxu0 %v10844_v0 }
 0x639   :  { %9781 = vmatpush3.bf16.msra.mxu0 %v11065_v27 }
 0x63a   :  { %9782 = vmatprep.subr.bf16.mxu0 %v10844_v0 }
 0x63d   :  { %9784 = vmatpush3.bf16.msra.mxu0 %v11084_v38 }
 0x63e   :  { %9785 = vmatprep.subr.bf16.mxu0 %v10844_v0 }
 0x641   :  { %9787 = vmatpush3.bf16.msra.mxu0 %v11103_v48 }
 0x642   :  { %9788 = vmatprep.subr.bf16.mxu0 %v10844_v0 }
 0x645   :  { %9790 = vmatpush3.bf16.msra.mxu0 %v11119_v3 }
 0x646   :  { %9791 = vmatprep.subr.bf16.mxu0 %v10844_v0 }
 0x649   :  { %9793 = vmatpush3.bf16.msra.mxu0 %v11138_v26 }
 0x64a   :  { %9794 = vmatprep.subr.bf16.mxu0 %v10844_v0 }
 0x64d   :  { %9796 = vmatpush3.bf16.msra.mxu0 %v11155_v47 }
 0x64e   :  { %9797 = vmatprep.subr.bf16.mxu0 %v10844_v0 }
 0x650   :  { %8206 = vmatmul.mubr.f32.vlgmr.msra.gmra.mrb[4].mxu0 %v11568_v63 }
 0x651   :  { %9799 = vmatpush3.bf16.msra.mxu0 %v11016_v61  ;;  %8240 = vmatprep.mubr.msk.f32.mxu0 %vm10845_vm1, %v10846_v12 }
 0x652   :  { %9800 = vmatprep.subr.bf16.mxu0 %v10844_v0 }
 0x655   :  { %9802 = vmatpush3.bf16.msra.mxu0 %v11035_v10 }
 0x656   :  { %9803 = vmatprep.subr.bf16.mxu0 %v10844_v0 }
 0x659   :  { %9805 = vmatpush3.bf16.msra.mxu0 %v11053_v22 }
 0x65a   :  { %9806 = vmatprep.subr.bf16.mxu0 %v10844_v0 }
 0x65d   :  { %9808 = vmatpush3.bf16.msra.mxu0 %v11077_v34 }
 0x65e   :  { %9809 = vmatprep.subr.bf16.mxu0 %v10844_v0 }
 0x661   :  { %9811 = vmatpush3.bf16.msra.mxu0 %v11096_v45 }
 0x662   :  { %9812 = vmatprep.subr.bf16.mxu0 %v10844_v0 }
 0x665   :  { %9814 = vmatpush3.bf16.msra.mxu0 %v11116_v58 }
 0x666   :  { %9815 = vmatprep.subr.bf16.mxu0 %v10844_v0 }
 0x669   :  { %9817 = vmatpush3.bf16.msra.mxu0 %v11129_v21 }
 0x66a   :  { %9818 = vmatprep.subr.bf16.mxu0 %v10844_v0 }
 0x66d   :  { %9820 = vmatpush3.bf16.msra.mxu0 %v11140_v28 }
 0x66e   :  { %9965 = vmatprep.subr.bf16.mxu0 %v10844_v0 }
 0x670   :  { %8241 = vmatmul.mubr.f32.vlgmr.msra.gmra.mrb[4].mxu0 %v11568_v63 }
 0x671   :  { %9967 = vmatpush3.bf16.msra.mxu0 %v11016_v61  ;;  %8485 = vmatprep.mubr.msk.f32.mxu0 %vm10845_vm1, %v10846_v12 }
 0x672   :  { %9968 = vmatprep.subr.bf16.mxu0 %v10844_v0 }
 0x675   :  { %9970 = vmatpush3.bf16.msra.mxu0 %v11035_v10 }
 0x676   :  { %9971 = vmatprep.subr.bf16.mxu0 %v10844_v0 }
 0x679   :  { %9973 = vmatpush3.bf16.msra.mxu0 %v11053_v22 }
 0x67a   :  { %9974 = vmatprep.subr.bf16.mxu0 %v10844_v0 }
 0x67d   :  { %9976 = vmatpush3.bf16.msra.mxu0 %v11077_v34 }
 0x67e   :  { %9977 = vmatprep.subr.bf16.mxu0 %v10844_v0 }
 0x681   :  { %9979 = vmatpush3.bf16.msra.mxu0 %v11096_v45 }
 0x682   :  { %9980 = vmatprep.subr.bf16.mxu0 %v10844_v0 }
 0x685   :  { %9982 = vmatpush3.bf16.msra.mxu0 %v11116_v58 }
 0x686   :  { %9983 = vmatprep.subr.bf16.mxu0 %v10844_v0 }
 0x689   :  { %9985 = vmatpush3.bf16.msra.mxu0 %v11129_v21 }
 0x68a   :  { %9986 = vmatprep.subr.bf16.mxu0 %v10844_v0 }
 0x68d   :  { %9988 = vmatpush3.bf16.msra.mxu0 %v11140_v28 }
 0x68e   :  { %9989 = vmatprep.subr.bf16.mxu0 %v10844_v0 }
 0x743   :  { %v3197_v57 = vpop.f32.mrb[4].mxu0 }
 0x744   :  { %v10547_v49 = vadd.f32 %v11412_v40, %v3197_v57  ;;  %v8242_v50 = vpop.f32.mrb[5].mxu0 }
 0x746   :  { %v3201_v2 = vand.u32 2147483647, %v10547_v49 }
 0x748   :  { %v3202_v24 = vmul.f32 0.5, %v3201_v2 }
 0x74a   :  { %v3203_v16 = vmul.f32 1.442695, %v3202_v24 }
 0x74c   :  { %10681 = vpow2.f32 %v3203_v16 }
 0x756   :  { %v10682_v42 = vpop.eup %10681 }
 0x757   :  { %3205 = vrot.lane.b32.xlu0 %v10682_v42, %s10847_s19  ;;  %v3211_v43 = vmul.f32 %v10682_v42, %v11565_v44 }
 0x759   :  { %3212 = vrot.lane.b32.xlu1 %v3211_v43, %s10847_s19 }
 0x7c9   :  { %v3206_v30 = vpop.permute.xlu0 %3205 }
 0x7ca   :  { %v3207_v7 = vadd.f32 %v10682_v42, %v3206_v30 }
 0x7cb   :  { %v3213_v18 = vpop.permute.xlu1 %3212 }
 0x7cc   :  { %v3214_v35 = vadd.f32 %v3213_v18, %v3211_v43  ;;  %3208 = vrot.lane.b32.xlu0 %v3207_v7, %s10849_s25 }
 0x7ce   :  { %3215 = vrot.lane.b32.xlu1 %v3214_v35, %s10849_s25 }
 0x7d0   :  { %3225 = vrot.lane.b32.xlu0 %v11565_v44, %s10848_s20 }
 0x83e   :  { %v3209_v56 = vpop.permute.xlu0 %3208 }
 0x83f   :  { %v3210_v62 = vadd.f32 %v3209_v56, %v3207_v7 }
 0x840   :  { %v3216_v39 = vpop.permute.xlu1 %3215 }
 0x841   :  { %10683 = vrcp.f32 %v3210_v62  ;;  %v3217_v13 = vadd.f32 %v3216_v39, %v3214_v35 }
 0x842   :  { %v3226_v63 = vpop.permute.xlu0 %3225 }
 0x84b   :  { %v10684_v9 = vpop.eup %10683 }
 0x84c   :  { %v3219_v4 = vmul.f32 %v10684_v9, %v3217_v13 }
 0x84e   :  { %v3221_v32 = vadd.f32 %v3220_v17, %v3219_v4 }
 0x850   :  { %10685 = vtanh.f32 %v3221_v32  ;;  %v3889_v32 = vld [vmem:[#allocation2 + $0x6] sm:$0x3] }
 0x85a   :  { %v10686_v51 = vpop.eup %10685 }
 0x85b   :  { %3224 = vst [vmem:[#allocation11 + $0x4] sm:$0x3] %v10686_v51  ;;  %v3227_v41 = vsel %vm1207_vm2, %v10686_v51, %v3226_v63 }
 0x85c   :  { %v11694_v52 = vmul.f32 %v11562_v33, %v3227_v41 }
 0x85e   :  { %v11697_v44 = vand.u32 4294901760, %v11694_v52 }
 0x860   :  { %v3311_v23 = vsub.f32 %v11694_v52, %v11697_v44 }
 0x862   :  { %v3312_v11 = vand.u32 4294901760, %v3311_v23 }
 0x864   :  { %v3313_v57 = vsub.f32 %v3311_v23, %v3312_v11 }
 0x866   :  { %v3314_v49 = vand.u32 4294901760, %v3313_v57 }
 0x868   :  { %8276 = vmatmul.mubr.f32.vlgmr.msra.gmra.mrb[4].mxu1 %v3314_v49 }
 0x869   :  { %9847 = vmatpush3.bf16.msra.mxu1 %v11161_v1  ;;  %8310 = vmatprep.mubr.msk.f32.mxu1 %vm10845_vm1, %v10846_v12 }
 0x86a   :  { %9848 = vmatprep.subr.bf16.mxu1 %v10844_v0 }
 0x86d   :  { %9850 = vmatpush3.bf16.msra.mxu1 %v11174_v25 }
 0x86e   :  { %9851 = vmatprep.subr.bf16.mxu1 %v10844_v0 }
 0x871   :  { %9853 = vmatpush3.bf16.msra.mxu1 %v11180_v29 }
 0x872   :  { %9854 = vmatprep.subr.bf16.mxu1 %v10844_v0 }
 0x875   :  { %9856 = vmatpush3.bf16.msra.mxu1 %v11189_v46 }
 0x876   :  { %9857 = vmatprep.subr.bf16.mxu1 %v10844_v0 }
 0x879   :  { %9859 = vmatpush3.bf16.msra.mxu1 %v11197_v6 }
 0x87a   :  { %9860 = vmatprep.subr.bf16.mxu1 %v10844_v0 }
 0x87d   :  { %9862 = vmatpush3.bf16.msra.mxu1 %v11202_v55 }
 0x87e   :  { %9863 = vmatprep.subr.bf16.mxu1 %v10844_v0 }
 0x881   :  { %9865 = vmatpush3.bf16.msra.mxu1 %v11208_v19 }
 0x882   :  { %9866 = vmatprep.subr.bf16.mxu1 %v10844_v0 }
 0x885   :  { %9868 = vmatpush3.bf16.msra.mxu1 %v11212_v31 }
 0x886   :  { %9869 = vmatprep.subr.bf16.mxu1 %v10844_v0 }
 0x888   :  { %8311 = vmatmul.mubr.f32.vlgmr.msra.gmra.mrb[4].mxu1 %v11697_v44 }
 0x889   :  { %9871 = vmatpush3.bf16.msra.mxu1 %v11218_v36  ;;  %8345 = vmatprep.mubr.msk.f32.mxu1 %vm10845_vm1, %v10846_v12 }
 0x88a   :  { %9872 = vmatprep.subr.bf16.mxu1 %v10844_v0 }
 0x88d   :  { %9874 = vmatpush3.bf16.msra.mxu1 %v11225_v37 }
 0x88e   :  { %9875 = vmatprep.subr.bf16.mxu1 %v10844_v0 }
 0x891   :  { %9877 = vmatpush3.bf16.msra.mxu1 %v11233_v53 }
 0x892   :  { %9878 = vmatprep.subr.bf16.mxu1 %v10844_v0 }
 0x895   :  { %9880 = vmatpush3.bf16.msra.mxu1 %v11239_v54 }
 0x896   :  { %9881 = vmatprep.subr.bf16.mxu1 %v10844_v0 }
 0x899   :  { %9883 = vmatpush3.bf16.msra.mxu1 %v11245_v59 }
 0x89a   :  { %9884 = vmatprep.subr.bf16.mxu1 %v10844_v0 }
 0x89d   :  { %9886 = vmatpush3.bf16.msra.mxu1 %v11251_v60 }
 0x89e   :  { %9887 = vmatprep.subr.bf16.mxu1 %v10844_v0 }
 0x8a1   :  { %9889 = vmatpush3.bf16.msra.mxu1 %v11257_v8 }
 0x8a2   :  { %9890 = vmatprep.subr.bf16.mxu1 %v10844_v0 }
 0x8a5   :  { %9892 = vmatpush3.bf16.msra.mxu1 %v11263_v20 }
 0x8a6   :  { %9893 = vmatprep.subr.bf16.mxu1 %v10844_v0 }
 0x8a8   :  { %8346 = vmatmul.mubr.f32.vlgmr.msra.gmra.mrb[4].mxu1 %v3311_v23 }
 0x8a9   :  { %9895 = vmatpush3.bf16.msra.mxu1 %v11016_v61  ;;  %8380 = vmatprep.mubr.msk.f32.mxu1 %vm10845_vm1, %v10846_v12 }
 0x8aa   :  { %9896 = vmatprep.subr.bf16.mxu1 %v10844_v0 }
 0x8ad   :  { %9898 = vmatpush3.bf16.msra.mxu1 %v11035_v10 }
 0x8ae   :  { %9899 = vmatprep.subr.bf16.mxu1 %v10844_v0 }
 0x8b1   :  { %9901 = vmatpush3.bf16.msra.mxu1 %v11053_v22 }
 0x8b2   :  { %9902 = vmatprep.subr.bf16.mxu1 %v10844_v0 }
 0x8b5   :  { %9904 = vmatpush3.bf16.msra.mxu1 %v11077_v34 }
 0x8b6   :  { %9905 = vmatprep.subr.bf16.mxu1 %v10844_v0 }
 0x8b9   :  { %9907 = vmatpush3.bf16.msra.mxu1 %v11096_v45 }
 0x8ba   :  { %9908 = vmatprep.subr.bf16.mxu1 %v10844_v0 }
 0x8bd   :  { %9910 = vmatpush3.bf16.msra.mxu1 %v11116_v58 }
 0x8be   :  { %9911 = vmatprep.subr.bf16.mxu1 %v10844_v0 }
 0x8c1   :  { %9913 = vmatpush3.bf16.msra.mxu1 %v11129_v21 }
 0x8c2   :  { %9914 = vmatprep.subr.bf16.mxu1 %v10844_v0 }
 0x8c5   :  { %9916 = vmatpush3.bf16.msra.mxu1 %v11140_v28 }
 0x8c6   :  { %9917 = vmatprep.subr.bf16.mxu1 %v10844_v0 }
 0x8c8   :  { %8381 = vmatmul.mubr.f32.vlgmr.msra.gmra.mrb[4].mxu1 %v3312_v11 }
 0x8c9   :  { %9919 = vmatpush3.bf16.msra.mxu1 %v11025_v5  ;;  %8415 = vmatprep.mubr.msk.f32.mxu1 %vm10845_vm1, %v10846_v12 }
 0x8ca   :  { %9920 = vmatprep.subr.bf16.mxu1 %v10844_v0 }
 0x8cd   :  { %9922 = vmatpush3.bf16.msra.mxu1 %v11044_v14 }
 0x8ce   :  { %9923 = vmatprep.subr.bf16.mxu1 %v10844_v0 }
 0x8d1   :  { %9925 = vmatpush3.bf16.msra.mxu1 %v11065_v27 }
 0x8d2   :  { %9926 = vmatprep.subr.bf16.mxu1 %v10844_v0 }
 0x8d5   :  { %9928 = vmatpush3.bf16.msra.mxu1 %v11084_v38 }
 0x8d6   :  { %9929 = vmatprep.subr.bf16.mxu1 %v10844_v0 }
 0x8d9   :  { %9931 = vmatpush3.bf16.msra.mxu1 %v11103_v48 }
 0x8da   :  { %9932 = vmatprep.subr.bf16.mxu1 %v10844_v0 }
 0x8dd   :  { %9934 = vmatpush3.bf16.msra.mxu1 %v11119_v3 }
 0x8de   :  { %9935 = vmatprep.subr.bf16.mxu1 %v10844_v0 }
 0x8e1   :  { %9937 = vmatpush3.bf16.msra.mxu1 %v11138_v26 }
 0x8e2   :  { %9938 = vmatprep.subr.bf16.mxu1 %v10844_v0 }
 0x8e5   :  { %9940 = vmatpush3.bf16.msra.mxu1 %v11155_v47 }
 0x8e6   :  { %9941 = vmatprep.subr.bf16.mxu1 %v10844_v0 }
 0x8e8   :  { %8416 = vmatmul.mubr.f32.vlgmr.msra.gmra.mrb[4].mxu1 %v11697_v44 }
 0x8e9   :  { %9943 = vmatpush3.bf16.msra.mxu1 %v11016_v61  ;;  %8450 = vmatprep.mubr.msk.f32.mxu1 %vm10845_vm1, %v10846_v12 }
 0x8ea   :  { %9944 = vmatprep.subr.bf16.mxu1 %v10844_v0 }
 0x8ed   :  { %9946 = vmatpush3.bf16.msra.mxu1 %v11035_v10 }
 0x8ee   :  { %9947 = vmatprep.subr.bf16.mxu1 %v10844_v0 }
 0x8f1   :  { %9949 = vmatpush3.bf16.msra.mxu1 %v11053_v22 }
 0x8f2   :  { %9950 = vmatprep.subr.bf16.mxu1 %v10844_v0 }
 0x8f5   :  { %9952 = vmatpush3.bf16.msra.mxu1 %v11077_v34 }
 0x8f6   :  { %9953 = vmatprep.subr.bf16.mxu1 %v10844_v0 }
 0x8f9   :  { %9955 = vmatpush3.bf16.msra.mxu1 %v11096_v45 }
 0x8fa   :  { %9956 = vmatprep.subr.bf16.mxu1 %v10844_v0 }
 0x8fd   :  { %9958 = vmatpush3.bf16.msra.mxu1 %v11116_v58 }
 0x8fe   :  { %9959 = vmatprep.subr.bf16.mxu1 %v10844_v0 }
 0x901   :  { %9961 = vmatpush3.bf16.msra.mxu1 %v11129_v21 }
 0x902   :  { %9962 = vmatprep.subr.bf16.mxu1 %v10844_v0 }
 0x905   :  { %9964 = vmatpush3.bf16.msra.mxu1 %v11140_v28 }
 0x906   :  { %10109 = vmatprep.subr.bf16.mxu1 %v10844_v0 }
 0x908   :  { %8451 = vmatmul.mubr.f32.vlgmr.msra.gmra.mrb[4].mxu1 %v11697_v44 }
 0x909   :  { %10111 = vmatpush3.bf16.msra.mxu1 %v11016_v61  ;;  %8695 = vmatprep.mubr.msk.f32.mxu1 %vm10845_vm1, %v10846_v12 }
 0x90a   :  { %10112 = vmatprep.subr.bf16.mxu1 %v10844_v0 }
 0x90d   :  { %10114 = vmatpush3.bf16.msra.mxu1 %v11035_v10 }
 0x90e   :  { %10115 = vmatprep.subr.bf16.mxu1 %v10844_v0 }
 0x911   :  { %10117 = vmatpush3.bf16.msra.mxu1 %v11053_v22 }
 0x912   :  { %10118 = vmatprep.subr.bf16.mxu1 %v10844_v0 }
 0x915   :  { %10120 = vmatpush3.bf16.msra.mxu1 %v11077_v34 }
 0x916   :  { %10121 = vmatprep.subr.bf16.mxu1 %v10844_v0 }
 0x919   :  { %10123 = vmatpush3.bf16.msra.mxu1 %v11096_v45 }
 0x91a   :  { %10124 = vmatprep.subr.bf16.mxu1 %v10844_v0 }
 0x91d   :  { %10126 = vmatpush3.bf16.msra.mxu1 %v11116_v58 }
 0x91e   :  { %10127 = vmatprep.subr.bf16.mxu1 %v10844_v0 }
 0x921   :  { %10129 = vmatpush3.bf16.msra.mxu1 %v11129_v21 }
 0x922   :  { %10130 = vmatprep.subr.bf16.mxu1 %v10844_v0 }
 0x925   :  { %10132 = vmatpush3.bf16.msra.mxu1 %v11140_v28 }
 0x926   :  { %10133 = vmatprep.subr.bf16.mxu1 %v10844_v0 }
 0x9db   :  { %v3866_v50 = vpop.f32.mrb[4].mxu1 }
 0x9dc   :  { %v10548_v2 = vadd.f32 %v11412_v40, %v3866_v50  ;;  %v8452_v24 = vpop.f32.mrb[5].mxu1 }
 0x9dd   :  { %v11944_v24 = vld [vmem:[%s12323_s3] ss:$0 sm:$0xff] }
 0x9de   :  { %v3870_v16 = vand.u32 2147483647, %v10548_v2 }
 0x9e0   :  { %v3871_v42 = vmul.f32 0.5, %v3870_v16 }
 0x9e2   :  { %v3872_v43 = vmul.f32 1.442695, %v3871_v42 }
 0x9e4   :  { %10687 = vpow2.f32 %v3872_v43 }
 0x9ee   :  { %v10688_v30 = vpop.eup %10687 }
 0x9ef   :  { %3874 = vrot.lane.b32.xlu1 %v10688_v30, %s10847_s19  ;;  %v3880_v7 = vmul.f32 %v10688_v30, %v11694_v52 }
 0x9f1   :  { %3881 = vrot.lane.b32.xlu0 %v3880_v7, %s10847_s19 }
 0xa61   :  { %v3875_v18 = vpop.permute.xlu1 %3874 }
 0xa62   :  { %v3876_v35 = vadd.f32 %v10688_v30, %v3875_v18 }
 0xa63   :  { %v3882_v56 = vpop.permute.xlu0 %3881 }
 0xa64   :  { %v3883_v62 = vadd.f32 %v3882_v56, %v3880_v7  ;;  %3877 = vrot.lane.b32.xlu1 %v3876_v35, %s10849_s25 }
 0xa66   :  { %3884 = vrot.lane.b32.xlu0 %v3883_v62, %s10849_s25 }
 0xa68   :  { %3894 = vrot.lane.b32.xlu1 %v11694_v52, %s10848_s20 }
 0xad6   :  { %v3878_v40 = vpop.permute.xlu1 %3877 }
 0xad7   :  { %v3879_v39 = vadd.f32 %v3878_v40, %v3876_v35 }
 0xad8   :  { %v3885_v13 = vpop.permute.xlu0 %3884 }
 0xad9   :  { %10689 = vrcp.f32 %v3879_v39  ;;  %v3886_v9 = vadd.f32 %v3885_v13, %v3883_v62 }
 0xada   :  { %v3895_v41 = vpop.permute.xlu1 %3894 }
 0xae3   :  { %v10690_v4 = vpop.eup %10689 }
 0xae4   :  { %v3888_v17 = vmul.f32 %v10690_v4, %v3886_v9 }
 0xae6   :  { %v3890_v51 = vadd.f32 %v3889_v32, %v3888_v17 }
 0xae8   :  { %10691 = vtanh.f32 %v3890_v51 }
 0xaf2   :  { %v10692_v63 = vpop.eup %10691 }
 0xaf3   :  { %3893 = vst [vmem:[#allocation11 + $0x6] sm:$0x3] %v10692_v63  ;;  %v3896_v44 = vsel %vm1207_vm2, %v10692_v63, %v3895_v41  ;;  %v4558_v63 = vld [vmem:[#allocation2 + $0x8] sm:$0x3] }
 0xaf4   :  { %v11823_v23 = vmul.f32 %v11562_v33, %v3896_v44 }
 0xaf6   :  { %v11826_v52 = vand.u32 4294901760, %v11823_v23 }
 0xaf8   :  { %v3980_v11 = vsub.f32 %v11823_v23, %v11826_v52 }
 0xafa   :  { %v3981_v57 = vand.u32 4294901760, %v3980_v11 }
 0xafc   :  { %v3982_v49 = vsub.f32 %v3980_v11, %v3981_v57 }
 0xafe   :  { %v3983_v50 = vand.u32 4294901760, %v3982_v49 }
 0xb00   :  { %8486 = vmatmul.mubr.f32.vlgmr.msra.gmra.mrb[6].mxu0 %v3983_v50 }
 0xb01   :  { %9991 = vmatpush3.bf16.msra.mxu0 %v11161_v1  ;;  %8520 = vmatprep.mubr.msk.f32.mxu0 %vm10845_vm1, %v10846_v12 }
 0xb02   :  { %9992 = vmatprep.subr.bf16.mxu0 %v10844_v0 }
 0xb05   :  { %9994 = vmatpush3.bf16.msra.mxu0 %v11174_v25 }
 0xb06   :  { %9995 = vmatprep.subr.bf16.mxu0 %v10844_v0 }
 0xb09   :  { %9997 = vmatpush3.bf16.msra.mxu0 %v11180_v29 }
 0xb0a   :  { %9998 = vmatprep.subr.bf16.mxu0 %v10844_v0 }
 0xb0d   :  { %10000 = vmatpush3.bf16.msra.mxu0 %v11189_v46 }
 0xb0e   :  { %10001 = vmatprep.subr.bf16.mxu0 %v10844_v0 }
 0xb11   :  { %10003 = vmatpush3.bf16.msra.mxu0 %v11197_v6 }
 0xb12   :  { %10004 = vmatprep.subr.bf16.mxu0 %v10844_v0 }
 0xb15   :  { %10006 = vmatpush3.bf16.msra.mxu0 %v11202_v55 }
 0xb16   :  { %10007 = vmatprep.subr.bf16.mxu0 %v10844_v0 }
 0xb19   :  { %10009 = vmatpush3.bf16.msra.mxu0 %v11208_v19 }
 0xb1a   :  { %10010 = vmatprep.subr.bf16.mxu0 %v10844_v0 }
 0xb1d   :  { %10012 = vmatpush3.bf16.msra.mxu0 %v11212_v31 }
 0xb1e   :  { %10013 = vmatprep.subr.bf16.mxu0 %v10844_v0 }
 0xb20   :  { %8521 = vmatmul.mubr.f32.vlgmr.msra.gmra.mrb[6].mxu0 %v11826_v52 }
 0xb21   :  { %10015 = vmatpush3.bf16.msra.mxu0 %v11218_v36  ;;  %8555 = vmatprep.mubr.msk.f32.mxu0 %vm10845_vm1, %v10846_v12 }
 0xb22   :  { %10016 = vmatprep.subr.bf16.mxu0 %v10844_v0 }
 0xb25   :  { %10018 = vmatpush3.bf16.msra.mxu0 %v11225_v37 }
 0xb26   :  { %10019 = vmatprep.subr.bf16.mxu0 %v10844_v0 }
 0xb29   :  { %10021 = vmatpush3.bf16.msra.mxu0 %v11233_v53 }
 0xb2a   :  { %10022 = vmatprep.subr.bf16.mxu0 %v10844_v0 }
 0xb2d   :  { %10024 = vmatpush3.bf16.msra.mxu0 %v11239_v54 }
 0xb2e   :  { %10025 = vmatprep.subr.bf16.mxu0 %v10844_v0 }
 0xb31   :  { %10027 = vmatpush3.bf16.msra.mxu0 %v11245_v59 }
 0xb32   :  { %10028 = vmatprep.subr.bf16.mxu0 %v10844_v0 }
 0xb35   :  { %10030 = vmatpush3.bf16.msra.mxu0 %v11251_v60 }
 0xb36   :  { %10031 = vmatprep.subr.bf16.mxu0 %v10844_v0 }
 0xb39   :  { %10033 = vmatpush3.bf16.msra.mxu0 %v11257_v8 }
 0xb3a   :  { %10034 = vmatprep.subr.bf16.mxu0 %v10844_v0 }
 0xb3d   :  { %10036 = vmatpush3.bf16.msra.mxu0 %v11263_v20 }
 0xb3e   :  { %10037 = vmatprep.subr.bf16.mxu0 %v10844_v0 }
 0xb40   :  { %8556 = vmatmul.mubr.f32.vlgmr.msra.gmra.mrb[6].mxu0 %v3980_v11 }
 0xb41   :  { %10039 = vmatpush3.bf16.msra.mxu0 %v11016_v61  ;;  %8590 = vmatprep.mubr.msk.f32.mxu0 %vm10845_vm1, %v10846_v12 }
 0xb42   :  { %10040 = vmatprep.subr.bf16.mxu0 %v10844_v0 }
 0xb45   :  { %10042 = vmatpush3.bf16.msra.mxu0 %v11035_v10 }
 0xb46   :  { %10043 = vmatprep.subr.bf16.mxu0 %v10844_v0 }
 0xb49   :  { %10045 = vmatpush3.bf16.msra.mxu0 %v11053_v22 }
 0xb4a   :  { %10046 = vmatprep.subr.bf16.mxu0 %v10844_v0 }
 0xb4d   :  { %10048 = vmatpush3.bf16.msra.mxu0 %v11077_v34 }
 0xb4e   :  { %10049 = vmatprep.subr.bf16.mxu0 %v10844_v0 }
 0xb51   :  { %10051 = vmatpush3.bf16.msra.mxu0 %v11096_v45 }
 0xb52   :  { %10052 = vmatprep.subr.bf16.mxu0 %v10844_v0 }
 0xb55   :  { %10054 = vmatpush3.bf16.msra.mxu0 %v11116_v58 }
 0xb56   :  { %10055 = vmatprep.subr.bf16.mxu0 %v10844_v0 }
 0xb59   :  { %10057 = vmatpush3.bf16.msra.mxu0 %v11129_v21 }
 0xb5a   :  { %10058 = vmatprep.subr.bf16.mxu0 %v10844_v0 }
 0xb5d   :  { %10060 = vmatpush3.bf16.msra.mxu0 %v11140_v28 }
 0xb5e   :  { %10061 = vmatprep.subr.bf16.mxu0 %v10844_v0 }
 0xb60   :  { %8591 = vmatmul.mubr.f32.vlgmr.msra.gmra.mrb[6].mxu0 %v3981_v57 }
 0xb61   :  { %10063 = vmatpush3.bf16.msra.mxu0 %v11025_v5  ;;  %8625 = vmatprep.mubr.msk.f32.mxu0 %vm10845_vm1, %v10846_v12 }
 0xb62   :  { %10064 = vmatprep.subr.bf16.mxu0 %v10844_v0 }
 0xb65   :  { %10066 = vmatpush3.bf16.msra.mxu0 %v11044_v14 }
 0xb66   :  { %10067 = vmatprep.subr.bf16.mxu0 %v10844_v0 }
 0xb69   :  { %10069 = vmatpush3.bf16.msra.mxu0 %v11065_v27 }
 0xb6a   :  { %10070 = vmatprep.subr.bf16.mxu0 %v10844_v0 }
 0xb6d   :  { %10072 = vmatpush3.bf16.msra.mxu0 %v11084_v38 }
 0xb6e   :  { %10073 = vmatprep.subr.bf16.mxu0 %v10844_v0 }
 0xb71   :  { %10075 = vmatpush3.bf16.msra.mxu0 %v11103_v48 }
 0xb72   :  { %10076 = vmatprep.subr.bf16.mxu0 %v10844_v0 }
 0xb75   :  { %10078 = vmatpush3.bf16.msra.mxu0 %v11119_v3 }
 0xb76   :  { %10079 = vmatprep.subr.bf16.mxu0 %v10844_v0 }
 0xb79   :  { %10081 = vmatpush3.bf16.msra.mxu0 %v11138_v26 }
 0xb7a   :  { %10082 = vmatprep.subr.bf16.mxu0 %v10844_v0 }
 0xb7d   :  { %10084 = vmatpush3.bf16.msra.mxu0 %v11155_v47 }
 0xb7e   :  { %10085 = vmatprep.subr.bf16.mxu0 %v10844_v0 }
 0xb80   :  { %8626 = vmatmul.mubr.f32.vlgmr.msra.gmra.mrb[6].mxu0 %v11826_v52 }
 0xb81   :  { %10087 = vmatpush3.bf16.msra.mxu0 %v11016_v61  ;;  %8660 = vmatprep.mubr.msk.f32.mxu0 %vm10845_vm1, %v10846_v12 }
 0xb82   :  { %10088 = vmatprep.subr.bf16.mxu0 %v10844_v0 }
 0xb85   :  { %10090 = vmatpush3.bf16.msra.mxu0 %v11035_v10 }
 0xb86   :  { %10091 = vmatprep.subr.bf16.mxu0 %v10844_v0 }
 0xb89   :  { %10093 = vmatpush3.bf16.msra.mxu0 %v11053_v22 }
 0xb8a   :  { %10094 = vmatprep.subr.bf16.mxu0 %v10844_v0 }
 0xb8d   :  { %10096 = vmatpush3.bf16.msra.mxu0 %v11077_v34 }
 0xb8e   :  { %10097 = vmatprep.subr.bf16.mxu0 %v10844_v0 }
 0xb91   :  { %10099 = vmatpush3.bf16.msra.mxu0 %v11096_v45 }
 0xb92   :  { %10100 = vmatprep.subr.bf16.mxu0 %v10844_v0 }
 0xb95   :  { %10102 = vmatpush3.bf16.msra.mxu0 %v11116_v58 }
 0xb96   :  { %10103 = vmatprep.subr.bf16.mxu0 %v10844_v0 }
 0xb99   :  { %10105 = vmatpush3.bf16.msra.mxu0 %v11129_v21 }
 0xb9a   :  { %10106 = vmatprep.subr.bf16.mxu0 %v10844_v0 }
 0xb9d   :  { %10108 = vmatpush3.bf16.msra.mxu0 %v11140_v28 }
 0xb9e   :  { %10253 = vmatprep.subr.bf16.mxu0 %v10844_v0 }
 0xba0   :  { %8661 = vmatmul.mubr.f32.vlgmr.msra.gmra.mrb[6].mxu0 %v11826_v52 }
 0xba1   :  { %10255 = vmatpush3.bf16.msra.mxu0 %v11016_v61  ;;  %8905 = vmatprep.mubr.msk.f32.mxu0 %vm10845_vm1, %v10846_v12 }
 0xba2   :  { %10256 = vmatprep.subr.bf16.mxu0 %v10844_v0 }
 0xba5   :  { %10258 = vmatpush3.bf16.msra.mxu0 %v11035_v10 }
 0xba6   :  { %10259 = vmatprep.subr.bf16.mxu0 %v10844_v0 }
 0xba9   :  { %10261 = vmatpush3.bf16.msra.mxu0 %v11053_v22 }
 0xbaa   :  { %10262 = vmatprep.subr.bf16.mxu0 %v10844_v0 }
 0xbad   :  { %10264 = vmatpush3.bf16.msra.mxu0 %v11077_v34 }
 0xbae   :  { %10265 = vmatprep.subr.bf16.mxu0 %v10844_v0 }
 0xbb1   :  { %10267 = vmatpush3.bf16.msra.mxu0 %v11096_v45 }
 0xbb2   :  { %10268 = vmatprep.subr.bf16.mxu0 %v10844_v0 }
 0xbb5   :  { %10270 = vmatpush3.bf16.msra.mxu0 %v11116_v58 }
 0xbb6   :  { %10271 = vmatprep.subr.bf16.mxu0 %v10844_v0 }
 0xbb9   :  { %10273 = vmatpush3.bf16.msra.mxu0 %v11129_v21 }
 0xbba   :  { %10274 = vmatprep.subr.bf16.mxu0 %v10844_v0 }
 0xbbd   :  { %10276 = vmatpush3.bf16.msra.mxu0 %v11140_v28 }
 0xbbe   :  { %10277 = vmatprep.subr.bf16.mxu0 %v10844_v0 }
 0xc73   :  { %v4535_v2 = vpop.f32.mrb[6].mxu0 }
 0xc74   :  { %v10549_v16 = vadd.f32 %v11944_v24, %v4535_v2  ;;  %v8662_v42 = vpop.f32.mrb[7].mxu0 }
 0xc76   :  { %v4539_v43 = vand.u32 2147483647, %v10549_v16 }
 0xc78   :  { %v4540_v30 = vmul.f32 0.5, %v4539_v43 }
 0xc7a   :  { %v4541_v7 = vmul.f32 1.442695, %v4540_v30 }
 0xc7c   :  { %10693 = vpow2.f32 %v4541_v7 }
 0xc86   :  { %v10694_v18 = vpop.eup %10693 }
 0xc87   :  { %4543 = vrot.lane.b32.xlu0 %v10694_v18, %s10847_s19  ;;  %v4549_v35 = vmul.f32 %v10694_v18, %v11823_v23 }
 0xc89   :  { %4550 = vrot.lane.b32.xlu1 %v4549_v35, %s10847_s19 }
 0xcf9   :  { %v4544_v56 = vpop.permute.xlu0 %4543 }
 0xcfa   :  { %v4545_v62 = vadd.f32 %v10694_v18, %v4544_v56 }
 0xcfb   :  { %v4551_v40 = vpop.permute.xlu1 %4550 }
 0xcfc   :  { %v4552_v39 = vadd.f32 %v4551_v40, %v4549_v35  ;;  %4546 = vrot.lane.b32.xlu0 %v4545_v62, %s10849_s25 }
 0xcfe   :  { %4553 = vrot.lane.b32.xlu1 %v4552_v39, %s10849_s25 }
 0xd00   :  { %4563 = vrot.lane.b32.xlu0 %v11823_v23, %s10848_s20 }
 0xd6e   :  { %v4547_v13 = vpop.permute.xlu0 %4546 }
 0xd6f   :  { %v4548_v9 = vadd.f32 %v4547_v13, %v4545_v62 }
 0xd70   :  { %v4554_v4 = vpop.permute.xlu1 %4553 }
 0xd71   :  { %10695 = vrcp.f32 %v4548_v9  ;;  %v4555_v17 = vadd.f32 %v4554_v4, %v4552_v39 }
 0xd72   :  { %v4564_v52 = vpop.permute.xlu0 %4563 }
 0xd7b   :  { %v10696_v32 = vpop.eup %10695 }
 0xd7c   :  { %v4557_v51 = vmul.f32 %v10696_v32, %v4555_v17 }
 0xd7e   :  { %v4559_v41 = vadd.f32 %v4558_v63, %v4557_v51 }
 0xd80   :  { %10697 = vtanh.f32 %v4559_v41  ;;  %v5227_v41 = vld [vmem:[#allocation2 + $0xa] sm:$0x3] }
 0xd8a   :  { %v10698_v44 = vpop.eup %10697 }
 0xd8b   :  { %4562 = vst [vmem:[#allocation11 + $0x8] sm:$0x3] %v10698_v44  ;;  %v4565_v11 = vsel %vm1207_vm2, %v10698_v44, %v4564_v52 }
 0xd8c   :  { %v11957_v57 = vmul.f32 %v11562_v33, %v4565_v11 }
 0xd8e   :  { %v11960_v23 = vand.u32 4294901760, %v11957_v57 }
 0xd90   :  { %v4649_v49 = vsub.f32 %v11957_v57, %v11960_v23 }
 0xd92   :  { %v4650_v50 = vand.u32 4294901760, %v4649_v49 }
 0xd94   :  { %v4651_v2 = vsub.f32 %v4649_v49, %v4650_v50 }
 0xd96   :  { %v4652_v16 = vand.u32 4294901760, %v4651_v2 }
 0xd98   :  { %8696 = vmatmul.mubr.f32.vlgmr.msra.gmra.mrb[6].mxu1 %v4652_v16 }
 0xd99   :  { %10135 = vmatpush3.bf16.msra.mxu1 %v11161_v1  ;;  %8730 = vmatprep.mubr.msk.f32.mxu1 %vm10845_vm1, %v10846_v12 }
 0xd9a   :  { %10136 = vmatprep.subr.bf16.mxu1 %v10844_v0 }
 0xd9d   :  { %10138 = vmatpush3.bf16.msra.mxu1 %v11174_v25 }
 0xd9e   :  { %10139 = vmatprep.subr.bf16.mxu1 %v10844_v0 }
 0xda1   :  { %10141 = vmatpush3.bf16.msra.mxu1 %v11180_v29 }
 0xda2   :  { %10142 = vmatprep.subr.bf16.mxu1 %v10844_v0 }
 0xda5   :  { %10144 = vmatpush3.bf16.msra.mxu1 %v11189_v46 }
 0xda6   :  { %10145 = vmatprep.subr.bf16.mxu1 %v10844_v0 }
 0xda9   :  { %10147 = vmatpush3.bf16.msra.mxu1 %v11197_v6 }
 0xdaa   :  { %10148 = vmatprep.subr.bf16.mxu1 %v10844_v0 }
 0xdad   :  { %10150 = vmatpush3.bf16.msra.mxu1 %v11202_v55 }
 0xdae   :  { %10151 = vmatprep.subr.bf16.mxu1 %v10844_v0 }
 0xdb1   :  { %10153 = vmatpush3.bf16.msra.mxu1 %v11208_v19 }
 0xdb2   :  { %10154 = vmatprep.subr.bf16.mxu1 %v10844_v0 }
 0xdb5   :  { %10156 = vmatpush3.bf16.msra.mxu1 %v11212_v31 }
 0xdb6   :  { %10157 = vmatprep.subr.bf16.mxu1 %v10844_v0 }
 0xdb8   :  { %8731 = vmatmul.mubr.f32.vlgmr.msra.gmra.mrb[6].mxu1 %v11960_v23 }
 0xdb9   :  { %10159 = vmatpush3.bf16.msra.mxu1 %v11218_v36  ;;  %8765 = vmatprep.mubr.msk.f32.mxu1 %vm10845_vm1, %v10846_v12 }
 0xdba   :  { %10160 = vmatprep.subr.bf16.mxu1 %v10844_v0 }
 0xdbd   :  { %10162 = vmatpush3.bf16.msra.mxu1 %v11225_v37 }
 0xdbe   :  { %10163 = vmatprep.subr.bf16.mxu1 %v10844_v0 }
 0xdc1   :  { %10165 = vmatpush3.bf16.msra.mxu1 %v11233_v53 }
 0xdc2   :  { %10166 = vmatprep.subr.bf16.mxu1 %v10844_v0 }
 0xdc5   :  { %10168 = vmatpush3.bf16.msra.mxu1 %v11239_v54 }
 0xdc6   :  { %10169 = vmatprep.subr.bf16.mxu1 %v10844_v0 }
 0xdc9   :  { %10171 = vmatpush3.bf16.msra.mxu1 %v11245_v59 }
 0xdca   :  { %10172 = vmatprep.subr.bf16.mxu1 %v10844_v0 }
 0xdcd   :  { %10174 = vmatpush3.bf16.msra.mxu1 %v11251_v60 }
 0xdce   :  { %10175 = vmatprep.subr.bf16.mxu1 %v10844_v0 }
 0xdd1   :  { %10177 = vmatpush3.bf16.msra.mxu1 %v11257_v8 }
 0xdd2   :  { %10178 = vmatprep.subr.bf16.mxu1 %v10844_v0 }
 0xdd5   :  { %10180 = vmatpush3.bf16.msra.mxu1 %v11263_v20 }
 0xdd6   :  { %10181 = vmatprep.subr.bf16.mxu1 %v10844_v0 }
 0xdd8   :  { %8766 = vmatmul.mubr.f32.vlgmr.msra.gmra.mrb[6].mxu1 %v4649_v49 }
 0xdd9   :  { %10183 = vmatpush3.bf16.msra.mxu1 %v11016_v61  ;;  %8800 = vmatprep.mubr.msk.f32.mxu1 %vm10845_vm1, %v10846_v12 }
 0xdda   :  { %10184 = vmatprep.subr.bf16.mxu1 %v10844_v0 }
 0xddd   :  { %10186 = vmatpush3.bf16.msra.mxu1 %v11035_v10 }
 0xdde   :  { %10187 = vmatprep.subr.bf16.mxu1 %v10844_v0 }
 0xde1   :  { %10189 = vmatpush3.bf16.msra.mxu1 %v11053_v22 }
 0xde2   :  { %10190 = vmatprep.subr.bf16.mxu1 %v10844_v0 }
 0xde5   :  { %10192 = vmatpush3.bf16.msra.mxu1 %v11077_v34 }
 0xde6   :  { %10193 = vmatprep.subr.bf16.mxu1 %v10844_v0 }
 0xde9   :  { %10195 = vmatpush3.bf16.msra.mxu1 %v11096_v45 }
 0xdea   :  { %10196 = vmatprep.subr.bf16.mxu1 %v10844_v0 }
 0xded   :  { %10198 = vmatpush3.bf16.msra.mxu1 %v11116_v58 }
 0xdee   :  { %10199 = vmatprep.subr.bf16.mxu1 %v10844_v0 }
 0xdf1   :  { %10201 = vmatpush3.bf16.msra.mxu1 %v11129_v21 }
 0xdf2   :  { %10202 = vmatprep.subr.bf16.mxu1 %v10844_v0 }
 0xdf5   :  { %10204 = vmatpush3.bf16.msra.mxu1 %v11140_v28 }
 0xdf6   :  { %10205 = vmatprep.subr.bf16.mxu1 %v10844_v0 }
 0xdf8   :  { %8801 = vmatmul.mubr.f32.vlgmr.msra.gmra.mrb[6].mxu1 %v4650_v50 }
 0xdf9   :  { %10207 = vmatpush3.bf16.msra.mxu1 %v11025_v5  ;;  %8835 = vmatprep.mubr.msk.f32.mxu1 %vm10845_vm1, %v10846_v12 }
 0xdfa   :  { %10208 = vmatprep.subr.bf16.mxu1 %v10844_v0 }
 0xdfd   :  { %10210 = vmatpush3.bf16.msra.mxu1 %v11044_v14 }
 0xdfe   :  { %10211 = vmatprep.subr.bf16.mxu1 %v10844_v0 }
 0xe01   :  { %10213 = vmatpush3.bf16.msra.mxu1 %v11065_v27 }
 0xe02   :  { %10214 = vmatprep.subr.bf16.mxu1 %v10844_v0 }
 0xe05   :  { %10216 = vmatpush3.bf16.msra.mxu1 %v11084_v38 }
 0xe06   :  { %10217 = vmatprep.subr.bf16.mxu1 %v10844_v0 }
 0xe09   :  { %10219 = vmatpush3.bf16.msra.mxu1 %v11103_v48 }
 0xe0a   :  { %10220 = vmatprep.subr.bf16.mxu1 %v10844_v0 }
 0xe0d   :  { %10222 = vmatpush3.bf16.msra.mxu1 %v11119_v3 }
 0xe0e   :  { %10223 = vmatprep.subr.bf16.mxu1 %v10844_v0 }
 0xe11   :  { %10225 = vmatpush3.bf16.msra.mxu1 %v11138_v26 }
 0xe12   :  { %10226 = vmatprep.subr.bf16.mxu1 %v10844_v0 }
 0xe15   :  { %10228 = vmatpush3.bf16.msra.mxu1 %v11155_v47 }
 0xe16   :  { %10229 = vmatprep.subr.bf16.mxu1 %v10844_v0 }
 0xe18   :  { %8836 = vmatmul.mubr.f32.vlgmr.msra.gmra.mrb[6].mxu1 %v11960_v23 }
 0xe19   :  { %10231 = vmatpush3.bf16.msra.mxu1 %v11016_v61  ;;  %8870 = vmatprep.mubr.msk.f32.mxu1 %vm10845_vm1, %v10846_v12 }
 0xe1a   :  { %10232 = vmatprep.subr.bf16.mxu1 %v10844_v0 }
 0xe1d   :  { %10234 = vmatpush3.bf16.msra.mxu1 %v11035_v10 }
 0xe1e   :  { %10235 = vmatprep.subr.bf16.mxu1 %v10844_v0 }
 0xe21   :  { %10237 = vmatpush3.bf16.msra.mxu1 %v11053_v22 }
 0xe22   :  { %10238 = vmatprep.subr.bf16.mxu1 %v10844_v0 }
 0xe25   :  { %10240 = vmatpush3.bf16.msra.mxu1 %v11077_v34 }
 0xe26   :  { %10241 = vmatprep.subr.bf16.mxu1 %v10844_v0 }
 0xe29   :  { %10243 = vmatpush3.bf16.msra.mxu1 %v11096_v45 }
 0xe2a   :  { %10244 = vmatprep.subr.bf16.mxu1 %v10844_v0 }
 0xe2d   :  { %10246 = vmatpush3.bf16.msra.mxu1 %v11116_v58 }
 0xe2e   :  { %10247 = vmatprep.subr.bf16.mxu1 %v10844_v0 }
 0xe31   :  { %10249 = vmatpush3.bf16.msra.mxu1 %v11129_v21 }
 0xe32   :  { %10250 = vmatprep.subr.bf16.mxu1 %v10844_v0 }
 0xe35   :  { %10252 = vmatpush3.bf16.msra.mxu1 %v11140_v28 }
 0xe36   :  { %10397 = vmatprep.subr.bf16.mxu1 %v10844_v0 }
 0xe38   :  { %8871 = vmatmul.mubr.f32.vlgmr.msra.gmra.mrb[6].mxu1 %v11960_v23 }
 0xe39   :  { %10399 = vmatpush3.bf16.msra.mxu1 %v11016_v61  ;;  %9115 = vmatprep.mubr.msk.f32.mxu1 %vm10845_vm1, %v10846_v12 }
 0xe3a   :  { %10400 = vmatprep.subr.bf16.mxu1 %v10844_v0 }
 0xe3d   :  { %10402 = vmatpush3.bf16.msra.mxu1 %v11035_v10 }
 0xe3e   :  { %10403 = vmatprep.subr.bf16.mxu1 %v10844_v0 }
 0xe41   :  { %10405 = vmatpush3.bf16.msra.mxu1 %v11053_v22 }
 0xe42   :  { %10406 = vmatprep.subr.bf16.mxu1 %v10844_v0 }
 0xe45   :  { %10408 = vmatpush3.bf16.msra.mxu1 %v11077_v34 }
 0xe46   :  { %10409 = vmatprep.subr.bf16.mxu1 %v10844_v0 }
 0xe49   :  { %10411 = vmatpush3.bf16.msra.mxu1 %v11096_v45 }
 0xe4a   :  { %10412 = vmatprep.subr.bf16.mxu1 %v10844_v0 }
 0xe4d   :  { %10414 = vmatpush3.bf16.msra.mxu1 %v11116_v58 }
 0xe4e   :  { %10415 = vmatprep.subr.bf16.mxu1 %v10844_v0 }
 0xe51   :  { %10417 = vmatpush3.bf16.msra.mxu1 %v11129_v21 }
 0xe52   :  { %10418 = vmatprep.subr.bf16.mxu1 %v10844_v0 }
 0xe55   :  { %10420 = vmatpush3.bf16.msra.mxu1 %v11140_v28 }
 0xe56   :  { %10421 = vmatprep.subr.bf16.mxu1 %v10844_v0 }
 0xf0b   :  { %v5204_v33 = vpop.f32.mrb[6].mxu1 }
 0xf0c   :  { %v10550_v42 = vadd.f32 %v11944_v24, %v5204_v33  ;;  %v8872_v43 = vpop.f32.mrb[7].mxu1 }
 0xf0e   :  { %v5208_v30 = vand.u32 2147483647, %v10550_v42 }
 0xf10   :  { %v5209_v7 = vmul.f32 0.5, %v5208_v30 }
 0xf12   :  { %v5210_v18 = vmul.f32 1.442695, %v5209_v7 }
 0xf14   :  { %10699 = vpow2.f32 %v5210_v18 }
 0xf1e   :  { %v10700_v35 = vpop.eup %10699 }
 0xf1f   :  { %5212 = vrot.lane.b32.xlu1 %v10700_v35, %s10847_s19  ;;  %v5218_v56 = vmul.f32 %v10700_v35, %v11957_v57 }
 0xf21   :  { %5219 = vrot.lane.b32.xlu0 %v5218_v56, %s10847_s19 }
 0xf91   :  { %v5213_v62 = vpop.permute.xlu1 %5212 }
 0xf92   :  { %v5214_v40 = vadd.f32 %v10700_v35, %v5213_v62 }
 0xf93   :  { %v5220_v39 = vpop.permute.xlu0 %5219 }
 0xf94   :  { %v5221_v13 = vadd.f32 %v5220_v39, %v5218_v56  ;;  %5215 = vrot.lane.b32.xlu1 %v5214_v40, %s10849_s25 }
 0xf96   :  { %5222 = vrot.lane.b32.xlu0 %v5221_v13, %s10849_s25 }
 0xf98   :  { %5232 = vrot.lane.b32.xlu1 %v11957_v57, %s10848_s20  ;;  %v12088_v57 = vld [vmem:[%s12324_s4] ss:$0 sm:$0xff]  ;;  %s10850_s4 = smov [#allocation11]  }
 0xf99   :  { %s6575_s28 = sshll.u32 %s10850_s4, 4  ;;  %s6576_s28 = int_to_ptr.vmem [resolvable:$true] %s6575_s28 }
 0xf9a   :  { %s10808_s29 = scalar_lea.vmem %s6576_s28, 256  ;;  %p10813_p5 = scmp.lt.s32.totalorder %s6576_s28, %s6576_s28 }
 0xf9b   :  { %p10809_p4 = scmp.ne.s32.totalorder %s6576_s28, %s10808_s29  ;;  %p10814_p6 = scmp.lt.s32.totalorder %s10808_s29, %s10808_s29 }
 0xf9d   :  { %p10815_p7 = por %p10814_p6, %p10813_p5 }
 0xf9f   :  { %p10816_p8 = pnand %p10815_p7, %p10809_p4 }
0x1006   :  { %v5216_v9 = vpop.permute.xlu1 %5215 }
0x1007   :  { %v5217_v4 = vadd.f32 %v5216_v9, %v5214_v40 }
0x1008   :  { %v5223_v17 = vpop.permute.xlu0 %5222 }
0x1009   :  { %10701 = vrcp.f32 %v5217_v4  ;;  %v5224_v32 = vadd.f32 %v5223_v17, %v5221_v13 }
0x100a   :  { %v5233_v11 = vpop.permute.xlu1 %5232 }
0x1013   :  { %v10702_v51 = vpop.eup %10701 }
0x1014   :  { %v5226_v63 = vmul.f32 %v10702_v51, %v5224_v32 }
0x1016   :  { %v5228_v44 = vadd.f32 %v5227_v41, %v5226_v63 }
0x1018   :  { %10703 = vtanh.f32 %v5228_v44 }
0x1022   :  { %v10704_v52 = vpop.eup %10703 }
0x1023   :  { %5231 = vst [vmem:[#allocation11 + $0xa] sm:$0x3] %v10704_v52  ;;  %v5234_v23 = vsel %vm1207_vm2, %v10704_v52, %v5233_v11  ;;  %v5896_v52 = vld [vmem:[#allocation2 + $0xc] sm:$0x3] }
0x1024   :  { %v12091_v49 = vmul.f32 %v12088_v57, %v5234_v23 }
0x1026   :  { %v12094_v50 = vand.u32 4294901760, %v12091_v49 }
0x1028   :  { %v5318_v2 = vsub.f32 %v12091_v49, %v12094_v50 }
0x102a   :  { %v5319_v16 = vand.u32 4294901760, %v5318_v2 }
0x102c   :  { %v5320_v33 = vsub.f32 %v5318_v2, %v5319_v16 }
0x102e   :  { %v5321_v42 = vand.u32 4294901760, %v5320_v33 }
0x1030   :  { %8906 = vmatmul.mubr.f32.vlgmr.msra.gmra.mrb[8].mxu0 %v5321_v42 }
0x1031   :  { %10279 = vmatpush3.bf16.msra.mxu0 %v11161_v1  ;;  %8940 = vmatprep.mubr.msk.f32.mxu0 %vm10845_vm1, %v10846_v12 }
0x1032   :  { %10280 = vmatprep.subr.bf16.mxu0 %v10844_v0 }
0x1035   :  { %10282 = vmatpush3.bf16.msra.mxu0 %v11174_v25 }
0x1036   :  { %10283 = vmatprep.subr.bf16.mxu0 %v10844_v0 }
0x1039   :  { %10285 = vmatpush3.bf16.msra.mxu0 %v11180_v29 }
0x103a   :  { %10286 = vmatprep.subr.bf16.mxu0 %v10844_v0 }
0x103d   :  { %10288 = vmatpush3.bf16.msra.mxu0 %v11189_v46 }
0x103e   :  { %10289 = vmatprep.subr.bf16.mxu0 %v10844_v0 }
0x1041   :  { %10291 = vmatpush3.bf16.msra.mxu0 %v11197_v6 }
0x1042   :  { %10292 = vmatprep.subr.bf16.mxu0 %v10844_v0 }
0x1045   :  { %10294 = vmatpush3.bf16.msra.mxu0 %v11202_v55 }
0x1046   :  { %10295 = vmatprep.subr.bf16.mxu0 %v10844_v0 }
0x1049   :  { %10297 = vmatpush3.bf16.msra.mxu0 %v11208_v19 }
0x104a   :  { %10298 = vmatprep.subr.bf16.mxu0 %v10844_v0 }
0x104d   :  { %10300 = vmatpush3.bf16.msra.mxu0 %v11212_v31 }
0x104e   :  { %10301 = vmatprep.subr.bf16.mxu0 %v10844_v0 }
0x1050   :  { %8941 = vmatmul.mubr.f32.vlgmr.msra.gmra.mrb[8].mxu0 %v12094_v50 }
0x1051   :  { %10303 = vmatpush3.bf16.msra.mxu0 %v11218_v36  ;;  %8975 = vmatprep.mubr.msk.f32.mxu0 %vm10845_vm1, %v10846_v12 }
0x1052   :  { %10304 = vmatprep.subr.bf16.mxu0 %v10844_v0 }
0x1055   :  { %10306 = vmatpush3.bf16.msra.mxu0 %v11225_v37 }
0x1056   :  { %10307 = vmatprep.subr.bf16.mxu0 %v10844_v0 }
0x1059   :  { %10309 = vmatpush3.bf16.msra.mxu0 %v11233_v53 }
0x105a   :  { %10310 = vmatprep.subr.bf16.mxu0 %v10844_v0 }
0x105d   :  { %10312 = vmatpush3.bf16.msra.mxu0 %v11239_v54 }
0x105e   :  { %10313 = vmatprep.subr.bf16.mxu0 %v10844_v0 }
0x1061   :  { %10315 = vmatpush3.bf16.msra.mxu0 %v11245_v59 }
0x1062   :  { %10316 = vmatprep.subr.bf16.mxu0 %v10844_v0 }
0x1065   :  { %10318 = vmatpush3.bf16.msra.mxu0 %v11251_v60 }
0x1066   :  { %10319 = vmatprep.subr.bf16.mxu0 %v10844_v0 }
0x1069   :  { %10321 = vmatpush3.bf16.msra.mxu0 %v11257_v8 }
0x106a   :  { %10322 = vmatprep.subr.bf16.mxu0 %v10844_v0 }
0x106d   :  { %10324 = vmatpush3.bf16.msra.mxu0 %v11263_v20 }
0x106e   :  { %10325 = vmatprep.subr.bf16.mxu0 %v10844_v0 }
0x1070   :  { %8976 = vmatmul.mubr.f32.vlgmr.msra.gmra.mrb[8].mxu0 %v5318_v2 }
0x1071   :  { %10327 = vmatpush3.bf16.msra.mxu0 %v11016_v61  ;;  %9010 = vmatprep.mubr.msk.f32.mxu0 %vm10845_vm1, %v10846_v12 }
0x1072   :  { %10328 = vmatprep.subr.bf16.mxu0 %v10844_v0 }
0x1075   :  { %10330 = vmatpush3.bf16.msra.mxu0 %v11035_v10 }
0x1076   :  { %10331 = vmatprep.subr.bf16.mxu0 %v10844_v0 }
0x1079   :  { %10333 = vmatpush3.bf16.msra.mxu0 %v11053_v22 }
0x107a   :  { %10334 = vmatprep.subr.bf16.mxu0 %v10844_v0 }
0x107d   :  { %10336 = vmatpush3.bf16.msra.mxu0 %v11077_v34 }
0x107e   :  { %10337 = vmatprep.subr.bf16.mxu0 %v10844_v0 }
0x1081   :  { %10339 = vmatpush3.bf16.msra.mxu0 %v11096_v45 }
0x1082   :  { %10340 = vmatprep.subr.bf16.mxu0 %v10844_v0 }
0x1085   :  { %10342 = vmatpush3.bf16.msra.mxu0 %v11116_v58 }
0x1086   :  { %10343 = vmatprep.subr.bf16.mxu0 %v10844_v0 }
0x1089   :  { %10345 = vmatpush3.bf16.msra.mxu0 %v11129_v21 }
0x108a   :  { %10346 = vmatprep.subr.bf16.mxu0 %v10844_v0 }
0x108d   :  { %10348 = vmatpush3.bf16.msra.mxu0 %v11140_v28 }
0x108e   :  { %10349 = vmatprep.subr.bf16.mxu0 %v10844_v0 }
0x1090   :  { %9011 = vmatmul.mubr.f32.vlgmr.msra.gmra.mrb[8].mxu0 %v5319_v16 }
0x1091   :  { %10351 = vmatpush3.bf16.msra.mxu0 %v11025_v5  ;;  %9045 = vmatprep.mubr.msk.f32.mxu0 %vm10845_vm1, %v10846_v12 }
0x1092   :  { %10352 = vmatprep.subr.bf16.mxu0 %v10844_v0 }
0x1095   :  { %10354 = vmatpush3.bf16.msra.mxu0 %v11044_v14 }
0x1096   :  { %10355 = vmatprep.subr.bf16.mxu0 %v10844_v0 }
0x1099   :  { %10357 = vmatpush3.bf16.msra.mxu0 %v11065_v27 }
0x109a   :  { %10358 = vmatprep.subr.bf16.mxu0 %v10844_v0 }
0x109d   :  { %10360 = vmatpush3.bf16.msra.mxu0 %v11084_v38 }
0x109e   :  { %10361 = vmatprep.subr.bf16.mxu0 %v10844_v0 }
0x10a1   :  { %10363 = vmatpush3.bf16.msra.mxu0 %v11103_v48 }
0x10a2   :  { %10364 = vmatprep.subr.bf16.mxu0 %v10844_v0 }
0x10a5   :  { %10366 = vmatpush3.bf16.msra.mxu0 %v11119_v3 }
0x10a6   :  { %10367 = vmatprep.subr.bf16.mxu0 %v10844_v0 }
0x10a9   :  { %10369 = vmatpush3.bf16.msra.mxu0 %v11138_v26 }
0x10aa   :  { %10370 = vmatprep.subr.bf16.mxu0 %v10844_v0 }
0x10ad   :  { %10372 = vmatpush3.bf16.msra.mxu0 %v11155_v47 }
0x10ae   :  { %10373 = vmatprep.subr.bf16.mxu0 %v10844_v0 }
0x10b0   :  { %9046 = vmatmul.mubr.f32.vlgmr.msra.gmra.mrb[8].mxu0 %v12094_v50 }
0x10b1   :  { %10375 = vmatpush3.bf16.msra.mxu0 %v11016_v61  ;;  %9080 = vmatprep.mubr.msk.f32.mxu0 %vm10845_vm1, %v10846_v12 }
0x10b2   :  { %10376 = vmatprep.subr.bf16.mxu0 %v10844_v0 }
0x10b5   :  { %10378 = vmatpush3.bf16.msra.mxu0 %v11035_v10 }
0x10b6   :  { %10379 = vmatprep.subr.bf16.mxu0 %v10844_v0 }
0x10b9   :  { %10381 = vmatpush3.bf16.msra.mxu0 %v11053_v22 }
0x10ba   :  { %10382 = vmatprep.subr.bf16.mxu0 %v10844_v0 }
0x10bd   :  { %10384 = vmatpush3.bf16.msra.mxu0 %v11077_v34 }
0x10be   :  { %10385 = vmatprep.subr.bf16.mxu0 %v10844_v0 }
0x10c1   :  { %10387 = vmatpush3.bf16.msra.mxu0 %v11096_v45 }
0x10c2   :  { %10388 = vmatprep.subr.bf16.mxu0 %v10844_v0 }
0x10c5   :  { %10390 = vmatpush3.bf16.msra.mxu0 %v11116_v58 }
0x10c6   :  { %10391 = vmatprep.subr.bf16.mxu0 %v10844_v0 }
0x10c9   :  { %10393 = vmatpush3.bf16.msra.mxu0 %v11129_v21 }
0x10ca   :  { %10394 = vmatprep.subr.bf16.mxu0 %v10844_v0 }
0x10cd   :  { %10396 = vmatpush3.bf16.msra.mxu0 %v11140_v28 }
0x10d0   :  { %9081 = vmatmul.mubr.f32.vlgmr.msra.gmra.mrb[8].mxu0 %v12094_v50 }
0x11a3   :  { %v5873_v43 = vpop.f32.mrb[8].mxu0 }
0x11a4   :  { %v10551_v30 = vadd.f32 %v11944_v24, %v5873_v43  ;;  %v9082_v7 = vpop.f32.mrb[9].mxu0 }
0x11a6   :  { %v5877_v18 = vand.u32 2147483647, %v10551_v30 }
0x11a8   :  { %v5878_v35 = vmul.f32 0.5, %v5877_v18 }
0x11aa   :  { %v5879_v56 = vmul.f32 1.442695, %v5878_v35 }
0x11ac   :  { %10705 = vpow2.f32 %v5879_v56 }
0x11b6   :  { %v10706_v62 = vpop.eup %10705 }
0x11b7   :  { %5881 = vrot.lane.b32.xlu0 %v10706_v62, %s10847_s19  ;;  %v5887_v40 = vmul.f32 %v10706_v62, %v12091_v49 }
0x11b9   :  { %5888 = vrot.lane.b32.xlu1 %v5887_v40, %s10847_s19 }
0x1229   :  { %v5882_v39 = vpop.permute.xlu0 %5881 }
0x122a   :  { %v5883_v13 = vadd.f32 %v10706_v62, %v5882_v39 }
0x122b   :  { %v5889_v9 = vpop.permute.xlu1 %5888 }
0x122c   :  { %v5890_v4 = vadd.f32 %v5889_v9, %v5887_v40  ;;  %5884 = vrot.lane.b32.xlu0 %v5883_v13, %s10849_s25 }
0x122e   :  { %5891 = vrot.lane.b32.xlu1 %v5890_v4, %s10849_s25 }
0x1230   :  { %5901 = vrot.lane.b32.xlu0 %v12091_v49, %s10848_s20 }
0x129e   :  { %v5885_v17 = vpop.permute.xlu0 %5884 }
0x129f   :  { %v5886_v32 = vadd.f32 %v5885_v17, %v5883_v13 }
0x12a0   :  { %v5892_v51 = vpop.permute.xlu1 %5891 }
0x12a1   :  { %10707 = vrcp.f32 %v5886_v32  ;;  %v5893_v63 = vadd.f32 %v5892_v51, %v5890_v4 }
0x12a2   :  { %v5902_v50 = vpop.permute.xlu0 %5901 }
0x12ab   :  { %v10708_v41 = vpop.eup %10707 }
0x12ac   :  { %v5895_v44 = vmul.f32 %v10708_v41, %v5893_v63 }
0x12ae   :  { %v5897_v11 = vadd.f32 %v5896_v52, %v5895_v44 }
0x12b0   :  { %10709 = vtanh.f32 %v5897_v11 }
0x12ba   :  { %v10710_v23 = vpop.eup %10709 }
0x12bb   :  { %5900 = vst [vmem:[#allocation11 + $0xc] sm:$0x3] %v10710_v23  ;;  %v5903_v2 = vsel %vm1207_vm2, %v10710_v23, %v5902_v50 }
0x12bc   :  { %v12201_v16 = vmul.f32 %v12088_v57, %v5903_v2 }
0x12be   :  { %v12204_v49 = vand.u32 4294901760, %v12201_v16 }
0x12c0   :  { %v5987_v33 = vsub.f32 %v12201_v16, %v12204_v49 }
0x12c2   :  { %v5988_v42 = vand.u32 4294901760, %v5987_v33 }
0x12c4   :  { %v5989_v43 = vsub.f32 %v5987_v33, %v5988_v42 }
0x12c6   :  { %v5990_v30 = vand.u32 4294901760, %v5989_v43 }
0x12c8   :  { %9116 = vmatmul.mubr.f32.vlgmr.msra.gmra.mrb[8].mxu1 %v5990_v30 }
0x12c9   :  { %10423 = vmatpush3.bf16.msra.mxu1 %v11161_v1  ;;  %9150 = vmatprep.mubr.msk.f32.mxu1 %vm10845_vm1, %v10846_v12  ;;  %v6565_v1 = vld [vmem:[#allocation2 + $0xe] sm:$0x3] }
0x12ca   :  { %10424 = vmatprep.subr.bf16.mxu1 %v10844_v0 }
0x12cd   :  { %10426 = vmatpush3.bf16.msra.mxu1 %v11174_v25 }
0x12ce   :  { %10427 = vmatprep.subr.bf16.mxu1 %v10844_v0 }
0x12d1   :  { %10429 = vmatpush3.bf16.msra.mxu1 %v11180_v29 }
0x12d2   :  { %10430 = vmatprep.subr.bf16.mxu1 %v10844_v0 }
0x12d5   :  { %10432 = vmatpush3.bf16.msra.mxu1 %v11189_v46 }
0x12d6   :  { %10433 = vmatprep.subr.bf16.mxu1 %v10844_v0 }
0x12d9   :  { %10435 = vmatpush3.bf16.msra.mxu1 %v11197_v6 }
0x12da   :  { %10436 = vmatprep.subr.bf16.mxu1 %v10844_v0 }
0x12dd   :  { %10438 = vmatpush3.bf16.msra.mxu1 %v11202_v55 }
0x12de   :  { %10439 = vmatprep.subr.bf16.mxu1 %v10844_v0 }
0x12e1   :  { %10441 = vmatpush3.bf16.msra.mxu1 %v11208_v19 }
0x12e2   :  { %10442 = vmatprep.subr.bf16.mxu1 %v10844_v0 }
0x12e5   :  { %10444 = vmatpush3.bf16.msra.mxu1 %v11212_v31 }
0x12e6   :  { %10445 = vmatprep.subr.bf16.mxu1 %v10844_v0 }
0x12e8   :  { %9151 = vmatmul.mubr.f32.vlgmr.msra.gmra.mrb[8].mxu1 %v12204_v49 }
0x12e9   :  { %10447 = vmatpush3.bf16.msra.mxu1 %v11218_v36  ;;  %9185 = vmatprep.mubr.msk.f32.mxu1 %vm10845_vm1, %v10846_v12 }
0x12ea   :  { %10448 = vmatprep.subr.bf16.mxu1 %v10844_v0 }
0x12ed   :  { %10450 = vmatpush3.bf16.msra.mxu1 %v11225_v37 }
0x12ee   :  { %10451 = vmatprep.subr.bf16.mxu1 %v10844_v0 }
0x12f1   :  { %10453 = vmatpush3.bf16.msra.mxu1 %v11233_v53 }
0x12f2   :  { %10454 = vmatprep.subr.bf16.mxu1 %v10844_v0 }
0x12f5   :  { %10456 = vmatpush3.bf16.msra.mxu1 %v11239_v54 }
0x12f6   :  { %10457 = vmatprep.subr.bf16.mxu1 %v10844_v0 }
0x12f9   :  { %10459 = vmatpush3.bf16.msra.mxu1 %v11245_v59 }
0x12fa   :  { %10460 = vmatprep.subr.bf16.mxu1 %v10844_v0 }
0x12fd   :  { %10462 = vmatpush3.bf16.msra.mxu1 %v11251_v60 }
0x12fe   :  { %10463 = vmatprep.subr.bf16.mxu1 %v10844_v0 }
0x1301   :  { %10465 = vmatpush3.bf16.msra.mxu1 %v11257_v8 }
0x1302   :  { %10466 = vmatprep.subr.bf16.mxu1 %v10844_v0 }
0x1305   :  { %10468 = vmatpush3.bf16.msra.mxu1 %v11263_v20 }
0x1306   :  { %10469 = vmatprep.subr.bf16.mxu1 %v10844_v0 }
0x1308   :  { %9186 = vmatmul.mubr.f32.vlgmr.msra.gmra.mrb[8].mxu1 %v5987_v33 }
0x1309   :  { %10471 = vmatpush3.bf16.msra.mxu1 %v11016_v61  ;;  %9220 = vmatprep.mubr.msk.f32.mxu1 %vm10845_vm1, %v10846_v12 }
0x130a   :  { %10472 = vmatprep.subr.bf16.mxu1 %v10844_v0 }
0x130d   :  { %10474 = vmatpush3.bf16.msra.mxu1 %v11035_v10 }
0x130e   :  { %10475 = vmatprep.subr.bf16.mxu1 %v10844_v0 }
0x1311   :  { %10477 = vmatpush3.bf16.msra.mxu1 %v11053_v22 }
0x1312   :  { %10478 = vmatprep.subr.bf16.mxu1 %v10844_v0 }
0x1315   :  { %10480 = vmatpush3.bf16.msra.mxu1 %v11077_v34 }
0x1316   :  { %10481 = vmatprep.subr.bf16.mxu1 %v10844_v0 }
0x1319   :  { %10483 = vmatpush3.bf16.msra.mxu1 %v11096_v45 }
0x131a   :  { %10484 = vmatprep.subr.bf16.mxu1 %v10844_v0 }
0x131d   :  { %10486 = vmatpush3.bf16.msra.mxu1 %v11116_v58 }
0x131e   :  { %10487 = vmatprep.subr.bf16.mxu1 %v10844_v0 }
0x1321   :  { %10489 = vmatpush3.bf16.msra.mxu1 %v11129_v21 }
0x1322   :  { %10490 = vmatprep.subr.bf16.mxu1 %v10844_v0 }
0x1325   :  { %10492 = vmatpush3.bf16.msra.mxu1 %v11140_v28 }
0x1326   :  { %10493 = vmatprep.subr.bf16.mxu1 %v10844_v0 }
0x1328   :  { %9221 = vmatmul.mubr.f32.vlgmr.msra.gmra.mrb[8].mxu1 %v5988_v42 }
0x1329   :  { %10495 = vmatpush3.bf16.msra.mxu1 %v11025_v5  ;;  %9255 = vmatprep.mubr.msk.f32.mxu1 %vm10845_vm1, %v10846_v12 }
0x132a   :  { %10496 = vmatprep.subr.bf16.mxu1 %v10844_v0 }
0x132d   :  { %10498 = vmatpush3.bf16.msra.mxu1 %v11044_v14 }
0x132e   :  { %10499 = vmatprep.subr.bf16.mxu1 %v10844_v0 }
0x1331   :  { %10501 = vmatpush3.bf16.msra.mxu1 %v11065_v27 }
0x1332   :  { %10502 = vmatprep.subr.bf16.mxu1 %v10844_v0 }
0x1335   :  { %10504 = vmatpush3.bf16.msra.mxu1 %v11084_v38 }
0x1336   :  { %10505 = vmatprep.subr.bf16.mxu1 %v10844_v0 }
0x1339   :  { %10507 = vmatpush3.bf16.msra.mxu1 %v11103_v48 }
0x133a   :  { %10508 = vmatprep.subr.bf16.mxu1 %v10844_v0 }
0x133d   :  { %10510 = vmatpush3.bf16.msra.mxu1 %v11119_v3 }
0x133e   :  { %10511 = vmatprep.subr.bf16.mxu1 %v10844_v0 }
0x1341   :  { %10513 = vmatpush3.bf16.msra.mxu1 %v11138_v26 }
0x1342   :  { %10514 = vmatprep.subr.bf16.mxu1 %v10844_v0 }
0x1345   :  { %10516 = vmatpush3.bf16.msra.mxu1 %v11155_v47 }
0x1346   :  { %10517 = vmatprep.subr.bf16.mxu1 %v10844_v0 }
0x1348   :  { %9256 = vmatmul.mubr.f32.vlgmr.msra.gmra.mrb[8].mxu1 %v12204_v49 }
0x1349   :  { %10519 = vmatpush3.bf16.msra.mxu1 %v11016_v61  ;;  %9290 = vmatprep.mubr.msk.f32.mxu1 %vm10845_vm1, %v10846_v12 }
0x134a   :  { %10520 = vmatprep.subr.bf16.mxu1 %v10844_v0 }
0x134d   :  { %10522 = vmatpush3.bf16.msra.mxu1 %v11035_v10 }
0x134e   :  { %10523 = vmatprep.subr.bf16.mxu1 %v10844_v0 }
0x1351   :  { %10525 = vmatpush3.bf16.msra.mxu1 %v11053_v22 }
0x1352   :  { %10526 = vmatprep.subr.bf16.mxu1 %v10844_v0 }
0x1355   :  { %10528 = vmatpush3.bf16.msra.mxu1 %v11077_v34 }
0x1356   :  { %10529 = vmatprep.subr.bf16.mxu1 %v10844_v0 }
0x1359   :  { %10531 = vmatpush3.bf16.msra.mxu1 %v11096_v45 }
0x135a   :  { %10532 = vmatprep.subr.bf16.mxu1 %v10844_v0 }
0x135d   :  { %10534 = vmatpush3.bf16.msra.mxu1 %v11116_v58 }
0x135e   :  { %10535 = vmatprep.subr.bf16.mxu1 %v10844_v0 }
0x1361   :  { %10537 = vmatpush3.bf16.msra.mxu1 %v11129_v21 }
0x1362   :  { %10538 = vmatprep.subr.bf16.mxu1 %v10844_v0 }
0x1365   :  { %10540 = vmatpush3.bf16.msra.mxu1 %v11140_v28 }
0x1368   :  { %9291 = vmatmul.mubr.f32.vlgmr.msra.gmra.mrb[8].mxu1 %v12204_v49 }
0x143b   :  { %v6542_v61 = vpop.f32.mrb[8].mxu1 }
0x143c   :  { %v10552_v5 = vadd.f32 %v11944_v24, %v6542_v61  ;;  %v9292_v10 = vpop.f32.mrb[9].mxu1 }
0x143e   :  { %v6546_v12 = vand.u32 2147483647, %v10552_v5 }
0x1440   :  { %v6547_v14 = vmul.f32 0.5, %v6546_v12 }
0x1442   :  { %v6548_v22 = vmul.f32 1.442695, %v6547_v14 }
0x1444   :  { %10711 = vpow2.f32 %v6548_v22 }
0x144e   :  { %v10712_v27 = vpop.eup %10711 }
0x144f   :  { %6550 = vrot.lane.b32.xlu1 %v10712_v27, %s10847_s19  ;;  %v6556_v34 = vmul.f32 %v10712_v27, %v12201_v16 }
0x1451   :  { %6557 = vrot.lane.b32.xlu0 %v6556_v34, %s10847_s19 }
0x14c1   :  { %v6551_v0 = vpop.permute.xlu1 %6550 }
0x14c2   :  { %v6552_v38 = vadd.f32 %v10712_v27, %v6551_v0 }
0x14c3   :  { %v6558_v45 = vpop.permute.xlu0 %6557 }
0x14c4   :  { %v6559_v48 = vadd.f32 %v6558_v45, %v6556_v34  ;;  %6553 = vrot.lane.b32.xlu1 %v6552_v38, %s10849_s25 }
0x14c6   :  { %6560 = vrot.lane.b32.xlu0 %v6559_v48, %s10849_s25 }
0x1536   :  { %v6554_v58 = vpop.permute.xlu1 %6553 }
0x1537   :  { %v6555_v3 = vadd.f32 %v6554_v58, %v6552_v38 }
0x1538   :  { %v6561_v21 = vpop.permute.xlu0 %6560 }
0x1539   :  { %10713 = vrcp.f32 %v6555_v3  ;;  %v6562_v26 = vadd.f32 %v6561_v21, %v6559_v48 }
0x1543   :  { %v10714_v28 = vpop.eup %10713 }
0x1544   :  { %v6564_v47 = vmul.f32 %v10714_v28, %v6562_v26 }
0x1546   :  { %v6566_v25 = vadd.f32 %v6565_v1, %v6564_v47 }
0x1548   :  { %10715 = vtanh.f32 %v6566_v25 }
0x1552   :  { %v10716_v29 = vpop.eup %10715 }
0x1553   :  { %6569 = vst [vmem:[#allocation11 + $0xe] sm:$0x3] %v10716_v29 }
0x1554   :  { %10819 = shalt.err (!%p10816_p8)
}
0x1555   :  { %s10820_s13 = scalar_lea.hbm %s12329_s9, 256 }
0x1556   :  { %p10821_p9 = scmp.ne.s32.totalorder %s12329_s9, %s10820_s13  ;;  %p10824_p10 = scmp.lt.u32.totalorder %s10820_s13, %s12329_s9 }
0x1558   :  { %p10826_p11 = pnand %p10824_p10, %p10821_p9 }
0x155a   :  { %10829 = shalt.err (!%p10826_p11)
}
0x155b   :  { %s10851_s15 = smov 2  }
0x155c   :  { %6581 = dma.vmem_to_hbm [thread:$0]  %s6576_s28, 256, %s12329_s9, [#allocation5], %s10847_s19, %s10847_s19, %s10851_s15  }
0x155d   :  { %10836 = dma.done.wait [#allocation5], 256  }
0x155e   :  { %10837 = vsyncadd [#allocation5], 4294967040 }
0x155f   :  { %6585 = vsyncpa [#allocation4], 1 }
0x1560   :  { %6586 = vsyncpa [#allocation7], 1 }
0x1561   :  { %6587 = vsyncpa [#allocation10], 1 }
0x1562   :  { %6588 = vsyncpa [#allocation5], 1 }

</bundles_post_ra>
